<compile_context>
chip_gen: v6e
topology: v6e:2x2x1
jax: 0.10.0
libtpu: 0.0.40
codegen_flags: <defaults>
</compile_context>

<pallas_src>
import jax
import jax.numpy as jnp
from jax.experimental import pallas as pl
from jax.experimental.pallas import tpu as pltpu

# Scoped-VMEM limit: > v5e's 16 MiB default, < v7x's 64 MiB physical.
VMEM_LIMIT_BYTES = 48 * 1024 * 1024


def _round_up(n, m):
    return ((n + m - 1) // m) * m


def _select_tile_b(B, tile_b):
    """Pick the batch tile. Guarantees >= 2 grid programs for B >= 256 so the
    'parallel' batch axis shards over v7x's two TensorCores (harmless on
    v5e/v6e). 128-granular tiles keep every block (8,128)-aligned, including
    the lane-dense (1, tb) output block."""
    if B > tile_b:
        return tile_b
    if B < 256:
        return B                      # tiny batch: one full-array tile
    return _round_up(pl.cdiv(B, 2), 128)


def critic_kernel(xa_ref,
                  w1_ref, b1_ref,
                  w2x_ref, w2a_ref, b2_ref,
                  w3_ref, b3_ref,
                  w4_ref, b4_ref,
                  out_ref):
    """Fused 4-layer MLP critic for one batch tile.

    Weights are VMEM-resident bf16, all matmuls accumulate in f32 on the MXU,
    ReLUs run in f32. The final N=1 layer is computed as an M=1 MXU matmul
    (w4_row @ h3.T) so the result is already a lane-dense (1, tb) row."""
    cdt = w1_ref.dtype                 # bf16 compute dtype for the MXU
    xa = xa_ref[...]                   # (tb, obs+act), pre-cast to bf16

    # linear1 + relu. w1 is lifted onto [x, a] with zero rows for `a` (exact).
    h1 = jnp.dot(xa, w1_ref[...], preferred_element_type=jnp.float32) + b1_ref[...]
    h1 = jnp.maximum(h1, 0.0)

    # cat([h1, a], 1) -> linear2 + relu, split-weight formulation (exact):
    #   cat([h1, a]) @ W2.T == h1 @ w2x + [x, a] @ w2a_ext
    h2 = (jnp.dot(h1.astype(cdt), w2x_ref[...], preferred_element_type=jnp.float32)
          + jnp.dot(xa, w2a_ref[...], preferred_element_type=jnp.float32)
          + b2_ref[...])
    h2 = jnp.maximum(h2, 0.0)

    # linear3 + relu (output width zero-padded 300 -> 384, lane-dense).
    h3 = jnp.dot(h2.astype(cdt), w3_ref[...], preferred_element_type=jnp.float32) + b3_ref[...]
    h3 = jnp.maximum(h3, 0.0)

    # linear4 (N=1) as an M=1 matmul: (1, 384) @ (384, tb) -> (1, tb).
    # Lane-dense result straight off the MXU drain; b4 is an SMEM scalar.
    q = jnp.dot(w4_ref[...], h3.astype(cdt).T,
                preferred_element_type=jnp.float32) + b4_ref[0]
    out_ref[...] = q.astype(out_ref.dtype)


def prepare_params(params, compute_dtype=jnp.bfloat16):
    """One-time conversion of torch-layout params to kernel layout.

    Call once at init (NOT per forward). Returns:
      (w1e, b1r, w2x, w2a_ext, b2r, w3_t, b3r, w4_row, b4r)
    All transformations are exact (zero-padding only); weights are cast to
    bf16 for the MXU, biases kept f32.
    """
    w1, b1, w2, b2, w3, b3, w4, b4 = params
    obs_dim = w1.shape[1]
    hid1 = w1.shape[0]                       # 1024
    hid2 = w2.shape[0]                       # 512
    act_dim = w2.shape[1] - hid1
    hid3 = w3.shape[0]                       # 300
    hid3_pad = _round_up(hid3, 128)          # 300 -> 384 (keep 128-granular)
    oa = obs_dim + act_dim

    # Layer 1 lifted to the concatenated [x, a] input (zero rows for `a`).
    w1e = jnp.zeros((oa, hid1), compute_dtype).at[:obs_dim, :].set(
        w1.T.astype(compute_dtype))
    # Layer 2 split: h1-part and ([x, a])-part (zero rows for `x`).
    w2_t = w2.T                                                    # (hid1+act, hid2)
    w2x = w2_t[:hid1, :].astype(compute_dtype)                     # (hid1, hid2)
    w2a_ext = jnp.zeros((oa, hid2), compute_dtype).at[obs_dim:, :].set(
        w2_t[hid1:, :].astype(compute_dtype))
    # Layer 3 zero-padded to 384 output lanes (padded b3 == 0, padded w4 == 0).
    w3_t = jnp.zeros((hid2, hid3_pad), compute_dtype).at[:, :hid3].set(
        w3.T.astype(compute_dtype))
    # Layer 4 as a single bf16 row for the M=1 MXU matmul.
    w4_row = jnp.zeros((1, hid3_pad), compute_dtype).at[:, :hid3].set(
        w4.reshape(1, -1).astype(compute_dtype))

    b1r = b1.reshape(1, -1).astype(jnp.float32)
    b2r = b2.reshape(1, -1).astype(jnp.float32)
    b3r = jnp.zeros((1, hid3_pad), jnp.float32).at[:, :hid3].set(b3)
    b4r = b4.reshape(1).astype(jnp.float32)        # 1-D SMEM scalar

    return (w1e, b1r, w2x, w2a_ext, b2r, w3_t, b3r, w4_row, b4r)


def critic_forward(x, a, prep, *, tile_b=1024):
    """Batch-tiled pallas_call. `prep` comes from prepare_params (no per-call
    weight transposes/slices here). Returns (B, 1) f32, matching the module."""
    (w1e, b1r, w2x, w2a_ext, b2r, w3_t, b3r, w4_row, b4r) = prep
    B = x.shape[0]
    oa = w1e.shape[0]
    hid1, hid2, hid3p = w1e.shape[1], w2x.shape[1], w3_t.shape[1]
    cdt = w1e.dtype

    # Single bf16 input stream: one DMA per grid step, no in-kernel casts.
    xa = jnp.concatenate([x, a], axis=1).astype(cdt)

    tb = _select_tile_b(B, tile_b)
    grid = (pl.cdiv(B, tb),)

    vmem = pltpu.MemorySpace.VMEM
    smem = pltpu.MemorySpace.SMEM

    def resident(arr):
        # Constant index_map -> block stays resident in VMEM across grid steps.
        return pl.BlockSpec(arr.shape, lambda i: (0, 0), memory_space=vmem)

    flops = 2 * B * (oa * hid1 + hid1 * hid2 + oa * hid2 + hid2 * hid3p + hid3p)
    bytes_accessed = (
        sum(int(w.size) * int(w.dtype.itemsize)
            for w in (w1e, b1r, w2x, w2a_ext, b2r, w3_t, b3r, w4_row, b4r))
        + B * (oa * 2 + 4))

    out_row = pl.pallas_call(
        critic_kernel,
        out_shape=jax.ShapeDtypeStruct((1, B), jnp.float32),   # lane-dense output
        grid=grid,
        in_specs=[
            pl.BlockSpec((tb, oa), lambda i: (i, 0), memory_space=vmem),   # [x, a]
            resident(w1e), resident(b1r),                                   # layer 1
            resident(w2x), resident(w2a_ext), resident(b2r),                # layer 2
            resident(w3_t), resident(b3r),                                  # layer 3
            resident(w4_row),                                               # layer 4 row
            pl.BlockSpec((1,), lambda i: (0,), memory_space=smem),          # b4 scalar
        ],
        out_specs=pl.BlockSpec((1, tb), lambda i: (0, i), memory_space=vmem),
        compiler_params=pltpu.CompilerParams(
            dimension_semantics=("parallel",),
            vmem_limit_bytes=VMEM_LIMIT_BYTES),
        cost_estimate=pl.CostEstimate(
            flops=flops, transcendentals=0, bytes_accessed=bytes_accessed),
    )(xa, w1e, b1r, w2x, w2a_ext, b2r, w3_t, b3r, w4_row, b4r)

    # (1, B) row -> module's (B, 1) column (same flat order; trivial reshape).
    return out_row.reshape(B, 1)


def init_params(key, obs_dim, action_dim):
    """Deterministic init mimicking PyTorch nn.Linear default:
    U(-1/sqrt(fan_in), 1/sqrt(fan_in)) for both weight and bias."""
    dims = [(1024, obs_dim),
            (512, 1024 + action_dim),
            (300, 512),
            (1, 300)]
    params = []
    for (out_d, in_d) in dims:
        key, kw, kb = jax.random.split(key, 3)
        bound = 1.0 / jnp.sqrt(jnp.float32(in_d))
        w = jax.random.uniform(kw, (out_d, in_d), jnp.float32, -bound, bound)
        b = jax.random.uniform(kb, (out_d,), jnp.float32, -bound, bound)
        params += [w, b]
    return tuple(params)


def critic_reference(x, a, params):
    """Plain-JAX f32 reference reproducing the PyTorch forward exactly."""
    (w1, b1, w2, b2, w3, b3, w4, b4) = params
    h = jax.nn.relu(x @ w1.T + b1)
    hc = jnp.concatenate([h, a], axis=1)
    h = jax.nn.relu(hc @ w2.T + b2)
    h = jax.nn.relu(h @ w3.T + b3)
    return h @ w4.T + b4


def critic_reference_prepared(x, a, prep):
    """Matched-precision (bf16 weights, f32 accum) reference for a tight check."""
    (w1e, b1r, w2x, w2a_ext, b2r, w3_t, b3r, w4_row, b4r) = prep
    cdt = w1e.dtype
    xa = jnp.concatenate([x, a], axis=1).astype(cdt)
    h1 = jnp.maximum(jnp.dot(xa, w1e, preferred_element_type=jnp.float32) + b1r, 0.0)
    h2 = jnp.maximum(jnp.dot(h1.astype(cdt), w2x, preferred_element_type=jnp.float32)
                     + jnp.dot(xa, w2a_ext, preferred_element_type=jnp.float32)
                     + b2r, 0.0)
    h3 = jnp.maximum(jnp.dot(h2.astype(cdt), w3_t, preferred_element_type=jnp.float32) + b3r, 0.0)
    q = jnp.dot(w4_row, h3.astype(cdt).T, preferred_element_type=jnp.float32) + b4r[0]
    return q.reshape(-1, 1)


if __name__ == "__main__":
    obs_dim, action_dim, batch = 8, 4, 2

    key = jax.random.PRNGKey(0)
    key, kx, ka = jax.random.split(key, 3)
    x = jax.random.normal(kx, (batch, obs_dim), jnp.float32)
    a = jax.random.normal(ka, (batch, action_dim), jnp.float32)

    params = init_params(key, obs_dim, action_dim)
    prep = prepare_params(params)          # one-time layout / dtype conversion

    qval = jax.block_until_ready(critic_forward(x, a, prep))
    assert qval.shape == (batch, 1)

    # Tight check vs. matched-precision (bf16 weights, f32 accum) reference.
    ref_bf16 = critic_reference_prepared(x, a, prep)
    assert jnp.allclose(qval, ref_bf16, atol=2e-3, rtol=2e-3), (qval, ref_bf16)

    # Loose check vs. the exact f32 PyTorch-style forward (bf16 quantization).
    ref_f32 = critic_reference(x, a, params)
    assert jnp.allclose(qval, ref_f32, atol=5e-2, rtol=5e-2), (qval, ref_f32)

    print("KERNEL_OK")
</pallas_src>

<mosaic_0001>
module attributes {stable_mosaic.version = 11 : i64} {
  func.func @critic_kernel(%arg0: i32, %arg1: memref<2x12xbf16, #tpu.memory_space<vmem>>, %arg2: memref<12x1024xbf16, #tpu.memory_space<vmem>>, %arg3: memref<1x1024xf32, #tpu.memory_space<vmem>>, %arg4: memref<1024x512xbf16, #tpu.memory_space<vmem>>, %arg5: memref<12x512xbf16, #tpu.memory_space<vmem>>, %arg6: memref<1x512xf32, #tpu.memory_space<vmem>>, %arg7: memref<512x384xbf16, #tpu.memory_space<vmem>>, %arg8: memref<1x384xf32, #tpu.memory_space<vmem>>, %arg9: memref<1x384xbf16, #tpu.memory_space<vmem>>, %arg10: memref<1xf32, #tpu.memory_space<smem>>, %arg11: memref<1x2xf32, #tpu.memory_space<vmem>>) attributes {dimension_semantics = [#tpu.dimension_semantics<parallel>], iteration_bounds = array<i64: 1>, scalar_prefetch = 0 : i64, scratch_operands = 0 : i64, tpu.core_type = #tpu.core_type<tc>, window_params = [{transform_indices = @transform_0, window_bounds = array<i64: 2, 12>}, {pipeline_mode = #tpu.pipeline_mode<synchronous>, transform_indices = @transform_1, window_bounds = array<i64: 12, 1024>}, {pipeline_mode = #tpu.pipeline_mode<synchronous>, transform_indices = @transform_2, window_bounds = array<i64: 1, 1024>}, {pipeline_mode = #tpu.pipeline_mode<synchronous>, transform_indices = @transform_3, window_bounds = array<i64: 1024, 512>}, {pipeline_mode = #tpu.pipeline_mode<synchronous>, transform_indices = @transform_4, window_bounds = array<i64: 12, 512>}, {pipeline_mode = #tpu.pipeline_mode<synchronous>, transform_indices = @transform_5, window_bounds = array<i64: 1, 512>}, {pipeline_mode = #tpu.pipeline_mode<synchronous>, transform_indices = @transform_6, window_bounds = array<i64: 512, 384>}, {pipeline_mode = #tpu.pipeline_mode<synchronous>, transform_indices = @transform_7, window_bounds = array<i64: 1, 384>}, {pipeline_mode = #tpu.pipeline_mode<synchronous>, transform_indices = @transform_8, window_bounds = array<i64: 1, 384>}, {transform_indices = @transform_9, window_bounds = array<i64: 1>}, {transform_indices = @transform_10, window_bounds = array<i64: 1, 2>}]} {
    %c0 = arith.constant 0 : index
    %c0_0 = arith.constant 0 : index
    %0 = vector.load %arg1[%c0, %c0_0] : memref<2x12xbf16, #tpu.memory_space<vmem>>, vector<2x12xbf16>
    %c0_1 = arith.constant 0 : index
    %c0_2 = arith.constant 0 : index
    %1 = vector.load %arg2[%c0_1, %c0_2] : memref<12x1024xbf16, #tpu.memory_space<vmem>>, vector<12x1024xbf16>
    %cst = arith.constant dense<0.000000e+00> : vector<2x1024xf32>
    %2 = tpu.matmul %0, %1, %cst {dimension_numbers = #tpu.dot_dimension_numbers<[1], [0], [0], [1], [0, 0, 1, 1], [], []>} : vector<2x12xbf16>, vector<12x1024xbf16>, vector<2x1024xf32> -> vector<2x1024xf32>
    %c0_3 = arith.constant 0 : index
    %c0_4 = arith.constant 0 : index
    %3 = vector.load %arg3[%c0_3, %c0_4] : memref<1x1024xf32, #tpu.memory_space<vmem>>, vector<1x1024xf32>
    %4 = vector.broadcast %3 : vector<1x1024xf32> to vector<2x1024xf32>
    %5 = arith.addf %2, %4 : vector<2x1024xf32>
    %cst_5 = arith.constant 0.000000e+00 : f32
    %6 = vector.broadcast %cst_5 : f32 to vector<2x1024xf32>
    %7 = arith.maximumf %5, %6 : vector<2x1024xf32>
    %8 = arith.truncf %7 : vector<2x1024xf32> to vector<2x1024xbf16>
    %c0_6 = arith.constant 0 : index
    %c0_7 = arith.constant 0 : index
    %9 = vector.load %arg4[%c0_6, %c0_7] : memref<1024x512xbf16, #tpu.memory_space<vmem>>, vector<1024x512xbf16>
    %cst_8 = arith.constant dense<0.000000e+00> : vector<2x512xf32>
    %10 = tpu.matmul %8, %9, %cst_8 {dimension_numbers = #tpu.dot_dimension_numbers<[1], [0], [0], [1], [0, 0, 1, 1], [], []>} : vector<2x1024xbf16>, vector<1024x512xbf16>, vector<2x512xf32> -> vector<2x512xf32>
    %c0_9 = arith.constant 0 : index
    %c0_10 = arith.constant 0 : index
    %11 = vector.load %arg5[%c0_9, %c0_10] : memref<12x512xbf16, #tpu.memory_space<vmem>>, vector<12x512xbf16>
    %cst_11 = arith.constant dense<0.000000e+00> : vector<2x512xf32>
    %12 = tpu.matmul %0, %11, %cst_11 {dimension_numbers = #tpu.dot_dimension_numbers<[1], [0], [0], [1], [0, 0, 1, 1], [], []>} : vector<2x12xbf16>, vector<12x512xbf16>, vector<2x512xf32> -> vector<2x512xf32>
    %13 = arith.addf %10, %12 : vector<2x512xf32>
    %c0_12 = arith.constant 0 : index
    %c0_13 = arith.constant 0 : index
    %14 = vector.load %arg6[%c0_12, %c0_13] : memref<1x512xf32, #tpu.memory_space<vmem>>, vector<1x512xf32>
    %15 = vector.broadcast %14 : vector<1x512xf32> to vector<2x512xf32>
    %16 = arith.addf %13, %15 : vector<2x512xf32>
    %cst_14 = arith.constant 0.000000e+00 : f32
    %17 = vector.broadcast %cst_14 : f32 to vector<2x512xf32>
    %18 = arith.maximumf %16, %17 : vector<2x512xf32>
    %19 = arith.truncf %18 : vector<2x512xf32> to vector<2x512xbf16>
    %c0_15 = arith.constant 0 : index
    %c0_16 = arith.constant 0 : index
    %20 = vector.load %arg7[%c0_15, %c0_16] : memref<512x384xbf16, #tpu.memory_space<vmem>>, vector<512x384xbf16>
    %cst_17 = arith.constant dense<0.000000e+00> : vector<2x384xf32>
    %21 = tpu.matmul %19, %20, %cst_17 {dimension_numbers = #tpu.dot_dimension_numbers<[1], [0], [0], [1], [0, 0, 1, 1], [], []>} : vector<2x512xbf16>, vector<512x384xbf16>, vector<2x384xf32> -> vector<2x384xf32>
    %c0_18 = arith.constant 0 : index
    %c0_19 = arith.constant 0 : index
    %22 = vector.load %arg8[%c0_18, %c0_19] : memref<1x384xf32, #tpu.memory_space<vmem>>, vector<1x384xf32>
    %23 = vector.broadcast %22 : vector<1x384xf32> to vector<2x384xf32>
    %24 = arith.addf %21, %23 : vector<2x384xf32>
    %cst_20 = arith.constant 0.000000e+00 : f32
    %25 = vector.broadcast %cst_20 : f32 to vector<2x384xf32>
    %26 = arith.maximumf %24, %25 : vector<2x384xf32>
    %c0_21 = arith.constant 0 : index
    %c0_22 = arith.constant 0 : index
    %27 = vector.load %arg9[%c0_21, %c0_22] : memref<1x384xbf16, #tpu.memory_space<vmem>>, vector<1x384xbf16>
    %28 = arith.truncf %26 : vector<2x384xf32> to vector<2x384xbf16>
    %29 = tpu.transpose %28, [1, 0] : vector<2x384xbf16> -> vector<384x2xbf16>
    %cst_23 = arith.constant dense<0.000000e+00> : vector<1x2xf32>
    %30 = tpu.matmul %27, %29, %cst_23 {dimension_numbers = #tpu.dot_dimension_numbers<[1], [0], [0], [1], [0, 0, 1, 1], [], []>} : vector<1x384xbf16>, vector<384x2xbf16>, vector<1x2xf32> -> vector<1x2xf32>
    %c0_24 = arith.constant 0 : index
    %31 = memref.load %arg10[%c0_24] : memref<1xf32, #tpu.memory_space<smem>>
    %32 = vector.broadcast %31 : f32 to vector<1x2xf32>
    %33 = arith.addf %30, %32 : vector<1x2xf32>
    %c0_25 = arith.constant 0 : index
    %c0_26 = arith.constant 0 : index
    %34 = vector.load %arg11[%c0_25, %c0_26] : memref<1x2xf32, #tpu.memory_space<vmem>>, vector<1x2xf32>
    tpu.vector_store %arg11[%c0_25, %c0_26], %33 {strides = array<i32>} : memref<1x2xf32, #tpu.memory_space<vmem>>, vector<1x2xf32>,
    return
  }
  func.func @transform_0(%arg0: i32) -> (i32, i32) {
    %c0_i32 = arith.constant 0 : i32
    %c0_i32_0 = arith.constant 0 : i32
    return %arg0, %c0_i32 : i32, i32
  }
  func.func @transform_1(%arg0: i32) -> (i32, i32) {
    %c0_i32 = arith.constant 0 : i32
    %c0_i32_0 = arith.constant 0 : i32
    %c0_i32_1 = arith.constant 0 : i32
    return %c0_i32, %c0_i32_0 : i32, i32
  }
  func.func @transform_2(%arg0: i32) -> (i32, i32) {
    %c0_i32 = arith.constant 0 : i32
    %c0_i32_0 = arith.constant 0 : i32
    %c0_i32_1 = arith.constant 0 : i32
    return %c0_i32, %c0_i32_0 : i32, i32
  }
  func.func @transform_3(%arg0: i32) -> (i32, i32) {
    %c0_i32 = arith.constant 0 : i32
    %c0_i32_0 = arith.constant 0 : i32
    %c0_i32_1 = arith.constant 0 : i32
    return %c0_i32, %c0_i32_0 : i32, i32
  }
  func.func @transform_4(%arg0: i32) -> (i32, i32) {
    %c0_i32 = arith.constant 0 : i32
    %c0_i32_0 = arith.constant 0 : i32
    %c0_i32_1 = arith.constant 0 : i32
    return %c0_i32, %c0_i32_0 : i32, i32
  }
  func.func @transform_5(%arg0: i32) -> (i32, i32) {
    %c0_i32 = arith.constant 0 : i32
    %c0_i32_0 = arith.constant 0 : i32
    %c0_i32_1 = arith.constant 0 : i32
    return %c0_i32, %c0_i32_0 : i32, i32
  }
  func.func @transform_6(%arg0: i32) -> (i32, i32) {
    %c0_i32 = arith.constant 0 : i32
    %c0_i32_0 = arith.constant 0 : i32
    %c0_i32_1 = arith.constant 0 : i32
    return %c0_i32, %c0_i32_0 : i32, i32
  }
  func.func @transform_7(%arg0: i32) -> (i32, i32) {
    %c0_i32 = arith.constant 0 : i32
    %c0_i32_0 = arith.constant 0 : i32
    %c0_i32_1 = arith.constant 0 : i32
    return %c0_i32, %c0_i32_0 : i32, i32
  }
  func.func @transform_8(%arg0: i32) -> (i32, i32) {
    %c0_i32 = arith.constant 0 : i32
    %c0_i32_0 = arith.constant 0 : i32
    %c0_i32_1 = arith.constant 0 : i32
    return %c0_i32, %c0_i32_0 : i32, i32
  }
  func.func @transform_9(%arg0: i32) -> i32 {
    %c0_i32 = arith.constant 0 : i32
    %c0_i32_0 = arith.constant 0 : i32
    return %c0_i32 : i32
  }
  func.func @transform_10(%arg0: i32) -> (i32, i32) {
    %c0_i32 = arith.constant 0 : i32
    %c0_i32_0 = arith.constant 0 : i32
    return %c0_i32, %arg0 : i32, i32
  }
}

</mosaic_0001>

<bundles_post_ra>
// kernel: tpu_custom_call.1
= control target key start
LH: loop header
LB: loop body
LE: loop exit
PB: predicated region body
PF: predicated region fallthrough
CT: control target
= control target key end

     0   :  { %16 = vsyncpa [#allocation4], 0  ;;  %s4726_s0 = inlined_call_operand.hbm [shape: bf16[2,12], index: 0, kind: input, shape index: {}]   ;;  %s4727_s1 = inlined_call_operand.hbm [shape: bf16[12,1024], index: 1, kind: input, shape index: {}]   ;;  %s4728_s2 = inlined_call_operand.hbm [shape: f32[1,1024], index: 2, kind: input, shape index: {}]   ;;  %s4729_s3 = inlined_call_operand.hbm [shape: bf16[1024,512], index: 3, kind: input, shape index: {}]   ;;  %s4730_s4 = inlined_call_operand.hbm [shape: bf16[12,512], index: 4, kind: input, shape index: {}]   ;;  %s4731_s5 = inlined_call_operand.vmem [shape: f32[1,512], index: 5, kind: input, shape index: {}]   ;;  %s4732_s6 = inlined_call_operand.hbm [shape: bf16[512,384], index: 6, kind: input, shape index: {}]   ;;  %s4733_s7 = inlined_call_operand.vmem [shape: f32[1,384], index: 7, kind: input, shape index: {}]   ;;  %s4734_s8 = inlined_call_operand.vmem [shape: bf16[1,384], index: 8, kind: input, shape index: {}]   ;;  %s4735_s9 = inlined_call_operand.<no memory space> [shape: f32[1], index: 9, kind: input, shape index: {}]   ;;  %s4736_s10 = inlined_call_operand.hbm [shape: f32[1,2], index: 10, kind: output, shape index: {}]  }
   0x1   :  { %17 = vsyncpa [#allocation7], 0 }
   0x2   :  { %18 = vsyncpa [#allocation10], 0 }
   0x3   :  { %19 = vsyncpa [#allocation13], 0 }
   0x4   :  { %20 = vsyncpa [#allocation5], 0  ;;  %s4489_s13 = smov [#allocation6]  }
   0x5   :  { %s36_s14 = sshll.u32 %s4489_s13, 4  ;;  %s37_s14 = int_to_ptr.vmem [resolvable:$true] %s36_s14 }
   0x6   :  { %s4347_s15 = scalar_lea.vmem %s37_s14, 1024  ;;  %p4352_p1 = scmp.lt.s32.totalorder %s37_s14, %s37_s14 }
   0x7   :  { %p4348_p0 = scmp.ne.s32.totalorder %s37_s14, %s4347_s15  ;;  %p4353_p2 = scmp.lt.s32.totalorder %s4347_s15, %s4347_s15 }
   0x9   :  { %p4354_p3 = por %p4353_p2, %p4352_p1 }
   0xb   :  { %p4355_p4 = pnand %p4354_p3, %p4348_p0 }
   0xd   :  { %4358 = shalt.err (!%p4355_p4)
}
   0xe   :  { %s4490_s16 = smov 512   ;;  %s4491_s17 = smov 32  }
   0xf   :  { %42 = dma.hbm_to_vmem [thread:$0]  %s4727_s1, 1024, %s37_s14, [#allocation7], %s4490_s16, %s4490_s16, %s4491_s17  }
  0x10   :  { %s4492_s20 = smov [#allocation9]  }
  0x11   :  { %s58_s21 = sshll.u32 %s4492_s20, 4  ;;  %s59_s21 = int_to_ptr.vmem [resolvable:$true] %s58_s21 }
  0x12   :  { %s4367_s22 = scalar_lea.vmem %s59_s21, 32768  ;;  %p4372_p6 = scmp.lt.s32.totalorder %s59_s21, %s59_s21 }
  0x13   :  { %p4368_p5 = scmp.ne.s32.totalorder %s59_s21, %s4367_s22  ;;  %p4373_p7 = scmp.lt.s32.totalorder %s4367_s22, %s4367_s22 }
  0x15   :  { %p4374_p8 = por %p4373_p7, %p4372_p6 }
  0x17   :  { %p4375_p9 = pnand %p4374_p8, %p4368_p5 }
  0x19   :  { %4378 = shalt.err (!%p4375_p9)
}
  0x1a   :  { %s4493_s23 = smov 256   ;;  %s4494_s24 = smov 16  }
  0x1b   :  { %64 = dma.hbm_to_vmem [thread:$0]  %s4729_s3, 32768, %s59_s21, [#allocation10], %s4493_s23, %s4493_s23, %s4494_s24  }
  0x1c   :  { %s4495_s1 = smov [#allocation3]   ;;  %s4496_s28 = smov [#allocation8]  }
  0x1d   :  { %s27_s27 = sshll.u32 %s4495_s1, 4  ;;  %s49_s29 = sshll.u32 %s4496_s28, 4  ;;  %s28_s27 = int_to_ptr.vmem [resolvable:$true] %s27_s27  ;;  %s50_s29 = int_to_ptr.vmem [resolvable:$true] %s49_s29 }
  0x1e   :  { %s4387_s30 = scalar_lea.vmem %s28_s27, 16  ;;  %s4391_s11 = scalar_lea.vmem %s28_s27, 32 }
  0x1f   :  { %p4388_p10 = scmp.ne.s32.totalorder %s28_s27, %s4387_s30  ;;  %p4392_p11 = scmp.lt.s32.totalorder %s28_s27, %s28_s27 }
  0x20   :  { %p4393_p12 = scmp.lt.s32.totalorder %s4391_s11, %s4387_s30 }
  0x22   :  { %p4394_p13 = por %p4393_p12, %p4392_p11 }
  0x24   :  { %p4395_p0 = pnand %p4394_p13, %p4388_p10 }
  0x26   :  { %4398 = shalt.err (!%p4395_p0)
}
  0x27   :  { %30 = dma.hbm_to_vmem [thread:$0]  %s4726_s0, 16, %s28_s27, [#allocation4]  }
  0x28   :  { %s4407_s14 = scalar_lea.vmem %s50_s29, 128  ;;  %p4412_p2 = scmp.lt.s32.totalorder %s50_s29, %s50_s29 }
  0x29   :  { %p4408_p1 = scmp.ne.s32.totalorder %s50_s29, %s4407_s14  ;;  %p4413_p3 = scmp.lt.s32.totalorder %s4407_s14, %s4407_s14 }
  0x2b   :  { %p4414_p4 = por %p4413_p3, %p4412_p2 }
  0x2d   :  { %p4415_p5 = pnand %p4414_p4, %p4408_p1 }
  0x2f   :  { %4418 = shalt.err (!%p4415_p5)
}
  0x30   :  { %52 = dma.hbm_to_vmem [thread:$0]  %s4728_s2, 128, %s50_s29, [#allocation7]  }
  0x31   :  { %s4497_s16 = smov [#allocation11]   ;;  %s4498_s18 = smov [#allocation12]  }
  0x32   :  { %s70_s17 = sshll.u32 %s4497_s16, 4  ;;  %s84_s19 = sshll.u32 %s4498_s18, 4  ;;  %s71_s17 = int_to_ptr.vmem [resolvable:$true] %s70_s17  ;;  %s85_s19 = int_to_ptr.vmem [resolvable:$true] %s84_s19 }
  0x33   :  { %s4427_s20 = scalar_lea.vmem %s71_s17, 512  ;;  %p4432_p7 = scmp.lt.s32.totalorder %s71_s17, %s71_s17 }
  0x34   :  { %p4428_p6 = scmp.ne.s32.totalorder %s71_s17, %s4427_s20  ;;  %p4433_p8 = scmp.lt.s32.totalorder %s4427_s20, %s4427_s20 }
  0x36   :  { %p4434_p9 = por %p4433_p8, %p4432_p7 }
  0x38   :  { %p4435_p10 = pnand %p4434_p9, %p4428_p6 }
  0x3a   :  { %4438 = shalt.err (!%p4435_p10)
}
  0x3b   :  { %76 = dma.hbm_to_vmem [thread:$0]  %s4730_s4, 512, %s71_s17, [#allocation10], %s4493_s23, %s4493_s23, %s4494_s24  }
  0x3c   :  { %s4447_s2 = scalar_lea.vmem %s85_s19, 12288  ;;  %p4452_p12 = scmp.lt.s32.totalorder %s85_s19, %s85_s19 }
  0x3d   :  { %p4448_p11 = scmp.ne.s32.totalorder %s85_s19, %s4447_s2  ;;  %p4453_p13 = scmp.lt.s32.totalorder %s4447_s2, %s4447_s2 }
  0x3f   :  { %p4454_p0 = por %p4453_p13, %p4452_p12 }
  0x41   :  { %p4455_p1 = pnand %p4454_p0, %p4448_p11 }
  0x43   :  { %4458 = shalt.err (!%p4455_p1)
}
  0x44   :  { %s4499_s22 = smov 192   ;;  %s4500_s25 = smov 12  }
  0x45   :  { %90 = dma.hbm_to_vmem [thread:$0]  %s4732_s6, 12288, %s85_s19, [#allocation13], %s4499_s22, %s4499_s22, %s4500_s25  }
  0x46   :  { %4479 = dma.done.wait [#allocation4], 16  }
  0x47   :  { %4480 = vsyncadd [#allocation4], 4294967280 }
  0x48   :  { %4481 = dma.done.wait [#allocation7], 1152  }
  0x49   :  { %4482 = vsyncadd [#allocation7], 4294966144 }
  0x4a   :  { %4483 = dma.done.wait [#allocation10], 33280  }
  0x4b   :  { %4484 = vsyncadd [#allocation10], 4294934016 }
  0x4c   :  { %4485 = dma.done.wait [#allocation13], 12288  }
  0x4d   :  { %4486 = vsyncadd [#allocation13], 4294955008  ;;  %v4501_v0 = vmov 0   ;;  %v117_v1 = vld [vmem:[#allocation6] sm:$0xff]  ;;  %vm203_vm0 = vcmask 1045504   ;;  %v118_v3 = vld [vmem:[#allocation6 + $0x8] sm:$0xff] }
  0x4e   :  { %260 = vmatprep.mubr.bf16.mxu0 %v4501_v0  ;;  %301 = vmatprep.mubr.bf16.mxu1 %v4501_v0  ;;  %v121_v2 = vld [vmem:[#allocation6 + $0x20] sm:$0x33]  ;;  %v122_v5 = vld [vmem:[#allocation6 + $0x28] sm:$0x33]  ;;  %v119_v7 = vld [vmem:[#allocation6 + $0x10] sm:$0xff]  ;;  %vm199_vm1 = vcmask 97280  }
  0x4f   :  { %v3376_v4 = vcombine.high %v117_v1, %v121_v2  ;;  %v3375_v6 = vcombine.low %v117_v1, %v121_v2  ;;  %v3378_v8 = vcombine.high %v118_v3, %v122_v5  ;;  %v3377_v9 = vcombine.low %v118_v3, %v122_v5  ;;  %v123_v10 = vld [vmem:[#allocation6 + $0x30] sm:$0x33]  ;;  %v120_v11 = vld [vmem:[#allocation6 + $0x18] sm:$0xff]  ;;  %s4505_s28 = smov [#allocation14]  }
  0x50   :  { %v124_v12 = vld [vmem:[#allocation6 + $0x38] sm:$0x33]  ;;  %v3380_v14 = vcombine.high %v119_v7, %v123_v10  ;;  %v3379_v15 = vcombine.low %v119_v7, %v123_v10  ;;  %v116_v18 = vld [vmem:[#allocation3] sm:$0x1]  ;;  %vm4504_vm2 = vmmov 0   ;;  %s3363_s29 = sshll.u32 %s4505_s28, 4  ;;  %s3364_s29 = int_to_ptr.vmem [resolvable:$true] %s3363_s29 }
  0x51   :  { %3383 = vmatprep.subr.msk.bf16.mxu0 %vm203_vm0, %v3376_v4  ;;  %v205_v13 = vsel %vm203_vm0, %v3375_v6, 0  ;;  %v3382_v16 = vcombine.high %v120_v11, %v124_v12  ;;  %3385 = vmatprep.subr.msk.bf16.mxu1 %vm203_vm0, %v3378_v8  ;;  %v211_v17 = vsel %vm203_vm0, %v3377_v9, 0  ;;  %v3381_v19 = vcombine.low %v120_v11, %v124_v12  ;;  %v3821_v22 = vld [vmem:[#allocation11 + $0x4] ss:$16 sps:$4 sm:$0x3f]   ;;  %s4459_s30 = scalar_lea.vmem %s3364_s29, 16  ;;  %p4464_p3 = scmp.lt.s32.totalorder %s3364_s29, %s3364_s29 }
  0x52   :  { %243 = vmatpush1.bf16.msra.mxu0 %v205_v13  ;;  %284 = vmatpush1.bf16.msra.mxu1 %v211_v17  ;;  %v217_v20 = vsel %vm203_vm0, %v3379_v15, 0  ;;  %v3824_v23 = vld [vmem:[#allocation11 + $0xc] ss:$16 sps:$4 sm:$0x3f]   ;;  %v3829_v28 = vld [vmem:[#allocation9 + $0xe4] ss:$16 sps:$4 sm:$0xff]   ;;  %p4460_p2 = scmp.ne.s32.totalorder %s3364_s29, %s4459_s30 }
  0x53   :  { %3387 = vmatprep.subr.msk.bf16.mxu0 %vm203_vm0, %v3380_v14  ;;  %3389 = vmatprep.subr.msk.bf16.mxu1 %vm203_vm0, %v3382_v16  ;;  %v223_v21 = vsel %vm203_vm0, %v3381_v19, 0  ;;  %v3823_v24 = vld [vmem:[#allocation11] ss:$16 sps:$4 sm:$0x3f]   ;;  %v3832_v29 = vld [vmem:[#allocation9 + $0x2e4] ss:$16 sps:$4 sm:$0xff]  }
  0x54   :  { %v3826_v25 = vld [vmem:[#allocation11 + $0x8] ss:$16 sps:$4 sm:$0x3f]   ;;  %v685_v26 = vsel %vm203_vm0, %v3823_v24, 0  ;;  %v3827_v30 = vld [vmem:[#allocation9 + $0xe0] ss:$16 sps:$4 sm:$0xff]  }
  0x55   :  { %3384 = vmatmul.mubr.msk.bf16.vlgmr.msra.gmra.mxu0 %vm199_vm1, %v116_v18  ;;  %3386 = vmatmul.mubr.msk.bf16.vlgmr.msra.gmra.mxu1 %vm199_vm1, %v116_v18  ;;  %v691_v27 = vsel %vm203_vm0, %v3826_v25, 0  ;;  %v3830_v31 = vld [vmem:[#allocation9 + $0x2e0] ss:$16 sps:$4 sm:$0xff]   ;;  %v3835_v32 = vld [vmem:[#allocation9 + $0xc4] ss:$16 sps:$4 sm:$0xff]   ;;  %vm3355_vm3 = vcmask 8192  }
  0x56   :  { %325 = vmatpush1.bf16.msra.mxu0 %v217_v20  ;;  %342 = vmatprep.mubr.bf16.mxu0 %v4501_v0  ;;  %v3838_v33 = vld [vmem:[#allocation9 + $0x2c4] ss:$16 sps:$4 sm:$0xff]   ;;  %v3833_v34 = vld [vmem:[#allocation9 + $0xc0] ss:$16 sps:$4 sm:$0xff]   ;;  %s4463_s11 = scalar_lea.vmem %s3364_s29, 32 }
  0x57   :  { %366 = vmatpush1.bf16.msra.mxu1 %v223_v21  ;;  %383 = vmatprep.mubr.bf16.mxu1 %v4501_v0  ;;  %v3836_v35 = vld [vmem:[#allocation9 + $0x2c0] ss:$16 sps:$4 sm:$0xff]   ;;  %v3841_v36 = vld [vmem:[#allocation9 + $0xa4] ss:$16 sps:$4 sm:$0xff]   ;;  %p4465_p4 = scmp.lt.s32.totalorder %s4463_s11, %s4459_s30 }
  0x58   :  { %3395 = vmatprep.subr.msk.bf16.mxu0 %vm203_vm0, %v3821_v22  ;;  %3397 = vmatprep.subr.msk.bf16.mxu1 %vm203_vm0, %v3824_v23  ;;  %v3844_v37 = vld [vmem:[#allocation9 + $0x2a4] ss:$16 sps:$4 sm:$0xff]   ;;  %v3839_v38 = vld [vmem:[#allocation9 + $0xa0] ss:$16 sps:$4 sm:$0xff]  }
  0x59   :  { %v3842_v39 = vld [vmem:[#allocation9 + $0x2a0] ss:$16 sps:$4 sm:$0xff]   ;;  %v3847_v40 = vld [vmem:[#allocation9 + $0x84] ss:$16 sps:$4 sm:$0xff]   ;;  %p4466_p5 = por %p4465_p4, %p4464_p3 }
  0x5a   :  { %v3850_v41 = vld [vmem:[#allocation9 + $0x284] ss:$16 sps:$4 sm:$0xff]   ;;  %v3845_v42 = vld [vmem:[#allocation9 + $0x80] ss:$16 sps:$4 sm:$0xff]  }
  0x5b   :  { %v3848_v43 = vld [vmem:[#allocation9 + $0x280] ss:$16 sps:$4 sm:$0xff]   ;;  %v3853_v44 = vld [vmem:[#allocation9 + $0x64] ss:$16 sps:$4 sm:$0xff]   ;;  %p4467_p6 = pnand %p4466_p5, %p4460_p2 }
  0x5c   :  { %v3856_v45 = vld [vmem:[#allocation9 + $0x264] ss:$16 sps:$4 sm:$0xff]   ;;  %v3851_v46 = vld [vmem:[#allocation9 + $0x60] ss:$16 sps:$4 sm:$0xff]  }
  0x5d   :  { %3388 = vmatmul.mubr.msk.bf16.vlgmr.msra.gmra.mxu0 %vm199_vm1, %v116_v18  ;;  %3390 = vmatmul.mubr.msk.bf16.vlgmr.msra.gmra.mxu1 %vm199_vm1, %v116_v18  ;;  %v3854_v47 = vld [vmem:[#allocation9 + $0x260] ss:$16 sps:$4 sm:$0xff]   ;;  %v3859_v48 = vld [vmem:[#allocation9 + $0x44] ss:$16 sps:$4 sm:$0xff]  }
  0x5e   :  { %711 = vmatpush1.bf16.msra.mxu0 %v685_v26  ;;  %728 = vmatprep.mubr.bf16.mxu0 %v4501_v0  ;;  %v3862_v49 = vld [vmem:[#allocation9 + $0x244] ss:$16 sps:$4 sm:$0xff]   ;;  %v3857_v50 = vld [vmem:[#allocation9 + $0x40] ss:$16 sps:$4 sm:$0xff]  }
  0x5f   :  { %752 = vmatpush1.bf16.msra.mxu1 %v691_v27  ;;  %769 = vmatprep.mubr.bf16.mxu1 %v4501_v0  ;;  %v3860_v51 = vld [vmem:[#allocation9 + $0x240] ss:$16 sps:$4 sm:$0xff]   ;;  %v3865_v52 = vld [vmem:[#allocation9 + $0x24] ss:$16 sps:$4 sm:$0xff]  }
  0x60   :  { %2058 = vmatprep.subr.bf16.mxu0 %v3829_v28  ;;  %2099 = vmatprep.subr.bf16.mxu1 %v3832_v29  ;;  %v3863_v53 = vld [vmem:[#allocation9 + $0x20] ss:$16 sps:$4 sm:$0xff]   ;;  %v3868_v54 = vld [vmem:[#allocation9 + $0x224] ss:$16 sps:$4 sm:$0xff]  }
  0x61   :  { %v3866_v55 = vld [vmem:[#allocation9 + $0x220] ss:$16 sps:$4 sm:$0xff]   ;;  %v3871_v56 = vld [vmem:[#allocation9 + $0x4] ss:$16 sps:$4 sm:$0xff]  }
  0x62   :  { %v3874_v57 = vld [vmem:[#allocation9 + $0x204] ss:$16 sps:$4 sm:$0xff]   ;;  %v3869_v58 = vld [vmem:[#allocation9] ss:$16 sps:$4 sm:$0xff]  }
  0x63   :  { %v3872_v59 = vld [vmem:[#allocation9 + $0x200] ss:$16 sps:$4 sm:$0xff]   ;;  %v3877_v60 = vld [vmem:[#allocation9 + $0x1e4] ss:$16 sps:$4 sm:$0xff]  }
  0x64   :  { %v3880_v61 = vld [vmem:[#allocation9 + $0x3e4] ss:$16 sps:$4 sm:$0xff]   ;;  %v3875_v62 = vld [vmem:[#allocation9 + $0x1e0] ss:$16 sps:$4 sm:$0xff]  }
  0x65   :  { %3396 = vmatmul.mubr.msk.bf16.vlgmr.msra.gmra.mxu0 %vm199_vm1, %v116_v18  ;;  %3398 = vmatmul.mubr.msk.bf16.vlgmr.msra.gmra.mxu1 %vm199_vm1, %v116_v18  ;;  %v3878_v63 = vld [vmem:[#allocation9 + $0x3e0] ss:$16 sps:$4 sm:$0xff]   ;;  %v3883_v0 = vld [vmem:[#allocation9 + $0x1c4] ss:$16 sps:$4 sm:$0xff]  }
  0x66   :  { %2059 = vmatpush1.bf16.msra.mxu0 %v3827_v30  ;;  %2100 = vmatpush1.bf16.msra.mxu1 %v3830_v31  ;;  %v3886_v1 = vld [vmem:[#allocation9 + $0x3c4] ss:$16 sps:$4 sm:$0xff]   ;;  %v3881_v2 = vld [vmem:[#allocation9 + $0x1c0] ss:$16 sps:$4 sm:$0xff]   ;;  %v127_v30 = vlaneseq }
  0x67   :  { %2060 = vmatprep.subr.bf16.mxu0 %v3835_v32  ;;  %2101 = vmatprep.subr.bf16.mxu1 %v3838_v33  ;;  %v3884_v3 = vld [vmem:[#allocation9 + $0x3c0] ss:$16 sps:$4 sm:$0xff]   ;;  %v3889_v4 = vld [vmem:[#allocation9 + $0x1a4] ss:$16 sps:$4 sm:$0xff]   ;;  %v4605_v32 = vld [vmem:[#allocation8] sm:$0xff] }
  0x68   :  { %v3892_v5 = vld [vmem:[#allocation9 + $0x3a4] ss:$16 sps:$4 sm:$0xff]   ;;  %v3887_v6 = vld [vmem:[#allocation9 + $0x1a0] ss:$16 sps:$4 sm:$0xff]   ;;  %v4603_v31 = vshrl.u32 %v127_v30, 7 }
  0x69   :  { %v3890_v7 = vld [vmem:[#allocation9 + $0x3a0] ss:$16 sps:$4 sm:$0xff]   ;;  %v3895_v8 = vld [vmem:[#allocation9 + $0x184] ss:$16 sps:$4 sm:$0xff]  }
  0x6a   :  { %2061 = vmatpush1.bf16.msra.mxu0 %v3833_v34  ;;  %2102 = vmatpush1.bf16.msra.mxu1 %v3836_v35  ;;  %v3898_v9 = vld [vmem:[#allocation9 + $0x384] ss:$16 sps:$4 sm:$0xff]   ;;  %v3893_v10 = vld [vmem:[#allocation9 + $0x180] ss:$16 sps:$4 sm:$0xff]   ;;  %v4608_v33 = vsub.s32 0, %v4603_v31  ;;  %v4611_v34 = vsub.s32 2, %v4603_v31 }
  0x6b   :  { %2062 = vmatprep.subr.bf16.mxu0 %v3841_v36  ;;  %2103 = vmatprep.subr.bf16.mxu1 %v3844_v37  ;;  %v3896_v11 = vld [vmem:[#allocation9 + $0x380] ss:$16 sps:$4 sm:$0xff]   ;;  %v3901_v12 = vld [vmem:[#allocation9 + $0x164] ss:$16 sps:$4 sm:$0xff]   ;;  %v4614_v35 = vsub.s32 1, %v4603_v31  ;;  %v141_v36 = vsub.s32 3, %v4603_v31 }
  0x6c   :  { %v3904_v13 = vld [vmem:[#allocation9 + $0x364] ss:$16 sps:$4 sm:$0xff]   ;;  %v3899_v14 = vld [vmem:[#allocation9 + $0x160] ss:$16 sps:$4 sm:$0xff]   ;;  %v130_v37 = vrot.slane %v4605_v32, %v4608_v33 }
  0x6d   :  { %v3902_v15 = vld [vmem:[#allocation9 + $0x360] ss:$16 sps:$4 sm:$0xff]   ;;  %v3907_v16 = vld [vmem:[#allocation9 + $0x144] ss:$16 sps:$4 sm:$0xff]  }
  0x6e   :  { %2063 = vmatpush1.bf16.msra.mxu0 %v3839_v38  ;;  %2104 = vmatpush1.bf16.msra.mxu1 %v3842_v39  ;;  %v3910_v17 = vld [vmem:[#allocation9 + $0x344] ss:$16 sps:$4 sm:$0xff]   ;;  %v3905_v18 = vld [vmem:[#allocation9 + $0x140] ss:$16 sps:$4 sm:$0xff]   ;;  %v138_v38 = vrot.slane %v4605_v32, %v4611_v34  ;;  %v134_v39 = vrot.slane %v4605_v32, %v4614_v35 }
  0x6f   :  { %2064 = vmatprep.subr.bf16.mxu0 %v3847_v40  ;;  %2105 = vmatprep.subr.bf16.mxu1 %v3850_v41  ;;  %v3908_v19 = vld [vmem:[#allocation9 + $0x340] ss:$16 sps:$4 sm:$0xff]   ;;  %v3913_v20 = vld [vmem:[#allocation9 + $0x124] ss:$16 sps:$4 sm:$0xff]   ;;  %v142_v41 = vrot.slane %v4605_v32, %v141_v36 }
  0x70   :  { %v3916_v21 = vld [vmem:[#allocation9 + $0x324] ss:$16 sps:$4 sm:$0xff]   ;;  %v3911_v22 = vld [vmem:[#allocation9 + $0x120] ss:$16 sps:$4 sm:$0xff]  }
  0x71   :  { %v3914_v23 = vld [vmem:[#allocation9 + $0x320] ss:$16 sps:$4 sm:$0xff]   ;;  %v3919_v24 = vld [vmem:[#allocation9 + $0x104] ss:$16 sps:$4 sm:$0xff]  }
  0x72   :  { %2065 = vmatpush1.bf16.msra.mxu0 %v3845_v42  ;;  %2106 = vmatpush1.bf16.msra.mxu1 %v3848_v43  ;;  %v3922_v25 = vld [vmem:[#allocation9 + $0x304] ss:$16 sps:$4 sm:$0xff]   ;;  %v3917_v26 = vld [vmem:[#allocation9 + $0x100] ss:$16 sps:$4 sm:$0xff]  }
  0x73   :  { %2066 = vmatprep.subr.bf16.mxu0 %v3853_v44  ;;  %2107 = vmatprep.subr.bf16.mxu1 %v3856_v45  ;;  %v3920_v27 = vld [vmem:[#allocation9 + $0x300] ss:$16 sps:$4 sm:$0xff]   ;;  %v3925_v28 = vld [vmem:[#allocation9 + $0x4e4] ss:$16 sps:$4 sm:$0xff]  }
  0x74   :  { %v3928_v29 = vld [vmem:[#allocation9 + $0x6e4] ss:$16 sps:$4 sm:$0xff]   ;;  %v3941_v30 = vld [vmem:[#allocation9 + $0x480] ss:$16 sps:$4 sm:$0xff]  }
  0x76   :  { %2067 = vmatpush1.bf16.msra.mxu0 %v3851_v46  ;;  %2108 = vmatpush1.bf16.msra.mxu1 %v3854_v47 }
  0x77   :  { %2068 = vmatprep.subr.bf16.mxu0 %v3859_v48  ;;  %2109 = vmatprep.subr.bf16.mxu1 %v3862_v49  ;;  %v149_v48 = vsub.s32 5, %v4603_v31 }
  0x7a   :  { %2069 = vmatpush1.bf16.msra.mxu0 %v3857_v50  ;;  %2110 = vmatpush1.bf16.msra.mxu1 %v3860_v51 }
  0x7b   :  { %2070 = vmatprep.subr.bf16.mxu0 %v3865_v52  ;;  %2111 = vmatprep.subr.bf16.mxu1 %v3868_v54 }
  0x7e   :  { %2071 = vmatpush1.bf16.msra.mxu0 %v3863_v53  ;;  %2112 = vmatpush1.bf16.msra.mxu1 %v3866_v55  ;;  %v157_v53 = vsub.s32 7, %v4603_v31 }
  0x7f   :  { %2072 = vmatprep.subr.bf16.mxu0 %v3871_v56  ;;  %2113 = vmatprep.subr.bf16.mxu1 %v3874_v57 }
  0x82   :  { %2073 = vmatpush1.bf16.msra.mxu0 %v3869_v58  ;;  %2114 = vmatpush1.bf16.msra.mxu1 %v3872_v59 }
  0x83   :  { %2074 = vmatprep.subr.bf16.mxu0 %v3877_v60  ;;  %2115 = vmatprep.subr.bf16.mxu1 %v3880_v61  ;;  %v3923_v61 = vld [vmem:[#allocation9 + $0x4e0] ss:$16 sps:$4 sm:$0xff]  }
  0x86   :  { %2075 = vmatpush2.bf16.msra.mxu0 %v3875_v62  ;;  %2116 = vmatpush2.bf16.msra.mxu1 %v3878_v63  ;;  %v150_v62 = vrot.slane %v4605_v32, %v149_v48  ;;  %v3958_v48 = vld [vmem:[#allocation9 + $0x644] ss:$16 sps:$4 sm:$0xff]  }
  0x87   :  { %2076 = vmatprep.subr.bf16.mxu0 %v3883_v0  ;;  %2117 = vmatprep.subr.bf16.mxu1 %v3886_v1  ;;  %v3926_v1 = vld [vmem:[#allocation9 + $0x6e0] ss:$16 sps:$4 sm:$0xff]  }
  0x8a   :  { %2077 = vmatpush2.bf16.msra.mxu0 %v3881_v2  ;;  %2118 = vmatpush2.bf16.msra.mxu1 %v3884_v3  ;;  %v3931_v2 = vld [vmem:[#allocation9 + $0x4c4] ss:$16 sps:$4 sm:$0xff]  }
  0x8b   :  { %2078 = vmatprep.subr.bf16.mxu0 %v3889_v4  ;;  %2119 = vmatprep.subr.bf16.mxu1 %v3892_v5  ;;  %v158_v4 = vrot.slane %v4605_v32, %v157_v53  ;;  %v3934_v5 = vld [vmem:[#allocation9 + $0x6c4] ss:$16 sps:$4 sm:$0xff]   ;;  %v3959_v53 = vld [vmem:[#allocation9 + $0x420] ss:$16 sps:$4 sm:$0xff]  }
  0x8e   :  { %2079 = vmatpush2.bf16.msra.mxu0 %v3887_v6  ;;  %2120 = vmatpush2.bf16.msra.mxu1 %v3890_v7 }
  0x8f   :  { %2080 = vmatprep.subr.bf16.mxu0 %v3895_v8  ;;  %2121 = vmatprep.subr.bf16.mxu1 %v3898_v9  ;;  %v3929_v8 = vld [vmem:[#allocation9 + $0x4c0] ss:$16 sps:$4 sm:$0xff]  }
  0x92   :  { %2081 = vmatpush2.bf16.msra.mxu0 %v3893_v10  ;;  %2122 = vmatpush2.bf16.msra.mxu1 %v3896_v11  ;;  %v3932_v11 = vld [vmem:[#allocation9 + $0x6c0] ss:$16 sps:$4 sm:$0xff]  }
  0x93   :  { %2082 = vmatprep.subr.bf16.mxu0 %v3901_v12  ;;  %2123 = vmatprep.subr.bf16.mxu1 %v3904_v13  ;;  %v3937_v12 = vld [vmem:[#allocation9 + $0x4a4] ss:$16 sps:$4 sm:$0xff]  }
  0x96   :  { %2083 = vmatpush2.bf16.msra.mxu0 %v3899_v14  ;;  %2124 = vmatpush2.bf16.msra.mxu1 %v3902_v15  ;;  %v3940_v15 = vld [vmem:[#allocation9 + $0x6a4] ss:$16 sps:$4 sm:$0xff]  }
  0x97   :  { %2084 = vmatprep.subr.bf16.mxu0 %v3907_v16  ;;  %2125 = vmatprep.subr.bf16.mxu1 %v3910_v17 }
  0x9a   :  { %2085 = vmatpush2.bf16.msra.mxu0 %v3905_v18  ;;  %2126 = vmatpush2.bf16.msra.mxu1 %v3908_v19 }
  0x9b   :  { %2086 = vmatprep.subr.bf16.mxu0 %v3913_v20  ;;  %2127 = vmatprep.subr.bf16.mxu1 %v3916_v21  ;;  %v3935_v20 = vld [vmem:[#allocation9 + $0x4a0] ss:$16 sps:$4 sm:$0xff]  }
  0x9e   :  { %2087 = vmatpush2.bf16.msra.mxu0 %v3911_v22  ;;  %2128 = vmatpush2.bf16.msra.mxu1 %v3914_v23  ;;  %v3938_v23 = vld [vmem:[#allocation9 + $0x6a0] ss:$16 sps:$4 sm:$0xff]  }
  0x9f   :  { %2088 = vmatprep.subr.bf16.mxu0 %v3919_v24  ;;  %2129 = vmatprep.subr.bf16.mxu1 %v3922_v25  ;;  %v3943_v24 = vld [vmem:[#allocation9 + $0x484] ss:$16 sps:$4 sm:$0xff]  }
  0xa2   :  { %2089 = vmatpush2.bf16.msra.mxu0 %v3917_v26  ;;  %2130 = vmatpush2.bf16.msra.mxu1 %v3920_v27  ;;  %v3946_v27 = vld [vmem:[#allocation9 + $0x684] ss:$16 sps:$4 sm:$0xff]  }
  0xa3   :  { %2140 = vmatprep.subr.bf16.mxu0 %v3925_v28  ;;  %2181 = vmatprep.subr.bf16.mxu1 %v3928_v29 }
 0x115   :  { %v262_v40 = vpop.f32.mrf.mxu0  ;;  %v303_v43 = vpop.f32.mrf.mxu1 }
 0x116   :  { %v263_v42 = vadd.f32 %v262_v40, %v130_v37  ;;  %v304_v44 = vadd.f32 %v303_v43, %v138_v38  ;;  %v3944_v38 = vld [vmem:[#allocation9 + $0x680] ss:$16 sps:$4 sm:$0xff]  }
 0x117   :  { %v264_v45 = vpop.f32.mrf.mxu0  ;;  %v305_v47 = vpop.f32.mrf.mxu1 }
 0x118   :  { %v265_v46 = vadd.f32 %v264_v45, %v134_v39  ;;  %v392_v49 = vmax.f32 %v263_v42, 0.0  ;;  %v394_v50 = vmax.f32 %v304_v44, 0.0  ;;  %v306_v51 = vadd.f32 %v305_v47, %v142_v41  ;;  %v3949_v39 = vld [vmem:[#allocation9 + $0x464] ss:$16 sps:$4 sm:$0xff]   ;;  %v3947_v44 = vld [vmem:[#allocation9 + $0x460] ss:$16 sps:$4 sm:$0xff]  }
 0x119   :  { %v266_v52 = vpop.f32.mrf.mxu0  ;;  %v307_v55 = vpop.f32.mrf.mxu1  ;;  %v3952_v41 = vld [vmem:[#allocation9 + $0x664] ss:$16 sps:$4 sm:$0xff]  }
 0x11a   :  { %v393_v54 = vmax.f32 %v265_v46, 0.0  ;;  %v395_v56 = vmax.f32 %v306_v51, 0.0  ;;  %v4628_v58 = vpack.c.bf16 %v394_v50, %v394_v50  ;;  %v4633_v63 = vpack.c.bf16 %v392_v49, %v392_v49  ;;  %v3950_v46 = vld [vmem:[#allocation9 + $0x660] ss:$16 sps:$4 sm:$0xff]   ;;  %v3955_v47 = vld [vmem:[#allocation9 + $0x444] ss:$16 sps:$4 sm:$0xff]  }
 0x11b   :  { %v267_v57 = vpop.f32.mrf.mxu0  ;;  %v308_v60 = vpop.f32.mrf.mxu1  ;;  %v3953_v49 = vld [vmem:[#allocation9 + $0x440] ss:$16 sps:$4 sm:$0xff]   ;;  %v3961_v51 = vld [vmem:[#allocation9 + $0x424] ss:$16 sps:$4 sm:$0xff]  }
 0x11c   :  { %v4630_v59 = vpack.c.bf16 %v393_v54, %v393_v54  ;;  %v4635_v0 = vpack.c.bf16 %v395_v56, %v395_v56  ;;  %v3956_v50 = vld [vmem:[#allocation9 + $0x640] ss:$16 sps:$4 sm:$0xff]   ;;  %v3964_v52 = vld [vmem:[#allocation9 + $0x624] ss:$16 sps:$4 sm:$0xff]  }
 0x11d   :  { %v4637_v3 = vpop.f32.mrf.mxu0  ;;  %v4641_v6 = vpop.f32.mrf.mxu1  ;;  %v3962_v54 = vld [vmem:[#allocation9 + $0x620] ss:$16 sps:$4 sm:$0xff]   ;;  %v3967_v55 = vld [vmem:[#allocation9 + $0x404] ss:$16 sps:$4 sm:$0xff]  }
 0x11e   :  { %2090 = vmatprep.mubr.bf16.mxu0 %v4630_v59  ;;  %2131 = vmatprep.mubr.bf16.mxu1 %v4635_v0  ;;  %v3970_v56 = vld [vmem:[#allocation9 + $0x604] ss:$16 sps:$4 sm:$0xff]   ;;  %v3965_v57 = vld [vmem:[#allocation9 + $0x400] ss:$16 sps:$4 sm:$0xff]  }
 0x11f   :  { %2091 = vmatmul.mubr.bf16.vlgmr.msra.gmra.mxu0 %v4633_v63  ;;  %v346_v7 = vpop.f32.mrf.mxu0  ;;  %2132 = vmatmul.mubr.bf16.vlgmr.msra.gmra.mxu1 %v4628_v58  ;;  %v387_v10 = vpop.f32.mrf.mxu1  ;;  %v3968_v60 = vld [vmem:[#allocation9 + $0x600] ss:$16 sps:$4 sm:$0xff]  }
 0x120   :  { %2141 = vmatpush1.bf16.msra.mxu0 %v3923_v61  ;;  %v347_v9 = vadd.f32 %v346_v7, %v150_v62  ;;  %2182 = vmatpush1.bf16.msra.mxu1 %v3926_v1  ;;  %v388_v14 = vadd.f32 %v387_v10, %v158_v4  ;;  %v3973_v61 = vld [vmem:[#allocation9 + $0x5e4] ss:$16 sps:$4 sm:$0xff]   ;;  %v3971_v1 = vld [vmem:[#allocation9 + $0x5e0] ss:$16 sps:$4 sm:$0xff]  }
 0x121   :  { %2142 = vmatprep.subr.bf16.mxu0 %v3931_v2  ;;  %v348_v13 = vpop.f32.mrf.mxu0  ;;  %2183 = vmatprep.subr.bf16.mxu1 %v3934_v5  ;;  %v389_v17 = vpop.f32.mrf.mxu1  ;;  %v3976_v62 = vld [vmem:[#allocation9 + $0x7e4] ss:$16 sps:$4 sm:$0xff]   ;;  %v3974_v2 = vld [vmem:[#allocation9 + $0x7e0] ss:$16 sps:$4 sm:$0xff]  }
 0x122   :  { %v397_v16 = vmax.f32 %v347_v9, 0.0  ;;  %v399_v18 = vmax.f32 %v388_v14, 0.0  ;;  %v3979_v4 = vld [vmem:[#allocation9 + $0x5c4] ss:$16 sps:$4 sm:$0xff]   ;;  %v3977_v7 = vld [vmem:[#allocation9 + $0x5c0] ss:$16 sps:$4 sm:$0xff]  }
 0x123   :  { %v349_v19 = vpop.f32.mrf.mxu0  ;;  %v390_v22 = vpop.f32.mrf.mxu1  ;;  %v3982_v5 = vld [vmem:[#allocation9 + $0x7c4] ss:$16 sps:$4 sm:$0xff]  }
 0x124   :  { %2143 = vmatpush1.bf16.msra.mxu0 %v3929_v8  ;;  %v4646_v21 = vpack.c.bf16 %v397_v16, %v397_v16  ;;  %2184 = vmatpush1.bf16.msra.mxu1 %v3932_v11  ;;  %v4648_v25 = vpack.c.bf16 %v399_v18, %v399_v18  ;;  %v3980_v8 = vld [vmem:[#allocation9 + $0x7c0] ss:$16 sps:$4 sm:$0xff]   ;;  %v3985_v9 = vld [vmem:[#allocation9 + $0x5a4] ss:$16 sps:$4 sm:$0xff]  }
 0x125   :  { %2144 = vmatprep.subr.bf16.mxu0 %v3937_v12  ;;  %v4650_v26 = vpop.f32.mrf.mxu0  ;;  %2185 = vmatprep.subr.bf16.mxu1 %v3940_v15  ;;  %v4653_v28 = vpop.f32.mrf.mxu1  ;;  %v3988_v10 = vld [vmem:[#allocation9 + $0x7a4] ss:$16 sps:$4 sm:$0xff]   ;;  %v3983_v11 = vld [vmem:[#allocation9 + $0x5a0] ss:$16 sps:$4 sm:$0xff]  }
 0x126   :  { %2172 = vmatprep.mubr.bf16.mxu0 %v4646_v21  ;;  %2213 = vmatprep.mubr.bf16.mxu1 %v4648_v25  ;;  %v3986_v12 = vld [vmem:[#allocation9 + $0x7a0] ss:$16 sps:$4 sm:$0xff]   ;;  %v3991_v13 = vld [vmem:[#allocation9 + $0x584] ss:$16 sps:$4 sm:$0xff]  }
 0x127   :  { %v4656_v29 = vpop.f32.mrf.mxu0  ;;  %v4658_v37 = vpop.f32.mrf.mxu1  ;;  %v3994_v14 = vld [vmem:[#allocation9 + $0x784] ss:$16 sps:$4 sm:$0xff]   ;;  %v3989_v15 = vld [vmem:[#allocation9 + $0x580] ss:$16 sps:$4 sm:$0xff]  }
 0x128   :  { %2145 = vmatpush1.bf16.msra.mxu0 %v3935_v20  ;;  %2186 = vmatpush1.bf16.msra.mxu1 %v3938_v23  ;;  %v3992_v16 = vld [vmem:[#allocation9 + $0x780] ss:$16 sps:$4 sm:$0xff]   ;;  %v3997_v17 = vld [vmem:[#allocation9 + $0x564] ss:$16 sps:$4 sm:$0xff]   ;;  %v153_v20 = vsub.s32 6, %v4603_v31  ;;  %v145_v23 = vsub.s32 4, %v4603_v31 }
 0x129   :  { %2146 = vmatprep.subr.bf16.mxu0 %v3943_v24  ;;  %v734_v40 = vpop.f32.mrf.mxu0  ;;  %2187 = vmatprep.subr.bf16.mxu1 %v3946_v27  ;;  %v775_v42 = vpop.f32.mrf.mxu1  ;;  %v4000_v18 = vld [vmem:[#allocation9 + $0x764] ss:$16 sps:$4 sm:$0xff]   ;;  %v3995_v19 = vld [vmem:[#allocation9 + $0x560] ss:$16 sps:$4 sm:$0xff]  }
 0x12a   :  { %v3998_v22 = vld [vmem:[#allocation9 + $0x760] ss:$16 sps:$4 sm:$0xff]   ;;  %v4003_v24 = vld [vmem:[#allocation9 + $0x544] ss:$16 sps:$4 sm:$0xff]  }
 0x12b   :  { %v735_v43 = vpop.f32.mrf.mxu0  ;;  %v776_v45 = vpop.f32.mrf.mxu1  ;;  %v4006_v27 = vld [vmem:[#allocation9 + $0x744] ss:$16 sps:$4 sm:$0xff]   ;;  %v4004_v40 = vld [vmem:[#allocation9 + $0x740] ss:$16 sps:$4 sm:$0xff]  }
 0x12c   :  { %2147 = vmatpush1.bf16.msra.mxu0 %v3941_v30  ;;  %2188 = vmatpush1.bf16.msra.mxu1 %v3944_v38  ;;  %v154_v30 = vrot.slane %v4605_v32, %v153_v20  ;;  %v4001_v38 = vld [vmem:[#allocation9 + $0x540] ss:$16 sps:$4 sm:$0xff]   ;;  %v4012_v42 = vld [vmem:[#allocation9 + $0x724] ss:$16 sps:$4 sm:$0xff]   ;;  %v4063_v20 = vld [vmem:[#allocation9 + $0xc] ss:$16 sps:$4 sm:$0xff]  }
 0x12d   :  { %2148 = vmatprep.subr.bf16.mxu0 %v3949_v39  ;;  %2189 = vmatprep.subr.bf16.mxu1 %v3952_v41  ;;  %v146_v39 = vrot.slane %v4605_v32, %v145_v23  ;;  %v4009_v41 = vld [vmem:[#allocation9 + $0x524] ss:$16 sps:$4 sm:$0xff]   ;;  %v4013_v32 = vld [vmem:[#allocation9 + $0x500] ss:$16 sps:$4 sm:$0xff]   ;;  %v4061_v23 = vld [vmem:[#allocation9 + $0x8] ss:$16 sps:$4 sm:$0xff]  }
 0x12e   :  { %v386_v43 = vadd.f32 %v4641_v6, %v154_v30  ;;  %v4024_v6 = vld [vmem:[#allocation9 + $0x2ec] ss:$16 sps:$4 sm:$0xff]  }
 0x12f   :  { %v345_v45 = vadd.f32 %v4637_v3, %v146_v39  ;;  %v4019_v3 = vld [vmem:[#allocation9 + $0xe8] ss:$16 sps:$4 sm:$0xff]   ;;  %v4072_v30 = vld [vmem:[#allocation9 + $0x3ec] ss:$16 sps:$4 sm:$0xff]  }
 0x130   :  { %2149 = vmatpush1.bf16.msra.mxu0 %v3947_v44  ;;  %2190 = vmatpush1.bf16.msra.mxu1 %v3950_v46  ;;  %v4007_v44 = vld [vmem:[#allocation9 + $0x520] ss:$16 sps:$4 sm:$0xff]   ;;  %v4070_v39 = vld [vmem:[#allocation9 + $0x3e8] ss:$16 sps:$4 sm:$0xff]  }
 0x131   :  { %2150 = vmatprep.subr.bf16.mxu0 %v3955_v47  ;;  %2191 = vmatprep.subr.bf16.mxu1 %v3958_v48  ;;  %v4010_v46 = vld [vmem:[#allocation9 + $0x720] ss:$16 sps:$4 sm:$0xff]   ;;  %v4015_v47 = vld [vmem:[#allocation9 + $0x504] ss:$16 sps:$4 sm:$0xff]  }
 0x132   :  { %v4018_v48 = vld [vmem:[#allocation9 + $0x704] ss:$16 sps:$4 sm:$0xff]  }
 0x134   :  { %2151 = vmatpush1.bf16.msra.mxu0 %v3953_v49  ;;  %2192 = vmatpush1.bf16.msra.mxu1 %v3956_v50  ;;  %v398_v49 = vmax.f32 %v386_v43, 0.0  ;;  %v396_v50 = vmax.f32 %v345_v45, 0.0  ;;  %v4076_v43 = vld [vmem:[#allocation9 + $0x3c8] ss:$16 sps:$4 sm:$0xff]   ;;  %v4084_v45 = vld [vmem:[#allocation9 + $0x3ac] ss:$16 sps:$4 sm:$0xff]  }
 0x135   :  { %2152 = vmatprep.subr.bf16.mxu0 %v3961_v51  ;;  %2193 = vmatprep.subr.bf16.mxu1 %v3964_v52  ;;  %v4016_v51 = vld [vmem:[#allocation9 + $0x700] ss:$16 sps:$4 sm:$0xff]   ;;  %v4021_v52 = vld [vmem:[#allocation9 + $0xec] ss:$16 sps:$4 sm:$0xff]  }
 0x138   :  { %2153 = vmatpush1.bf16.msra.mxu0 %v3959_v53  ;;  %2194 = vmatpush1.bf16.msra.mxu1 %v3962_v54  ;;  %v4666_v53 = vpack.c.bf16 %v398_v49, %v398_v49  ;;  %v4668_v54 = vpack.c.bf16 %v396_v50, %v396_v50  ;;  %v4090_v49 = vld [vmem:[#allocation9 + $0x38c] ss:$16 sps:$4 sm:$0xff]   ;;  %v4088_v50 = vld [vmem:[#allocation9 + $0x388] ss:$16 sps:$4 sm:$0xff]  }
 0x139   :  { %2154 = vmatprep.subr.bf16.mxu0 %v3967_v55  ;;  %2195 = vmatprep.subr.bf16.mxu1 %v3970_v56  ;;  %v4022_v55 = vld [vmem:[#allocation9 + $0x2e8] ss:$16 sps:$4 sm:$0xff]   ;;  %v4027_v56 = vld [vmem:[#allocation9 + $0xcc] ss:$16 sps:$4 sm:$0xff]  }
 0x13c   :  { %2155 = vmatpush1.bf16.msra.mxu0 %v3965_v57  ;;  %2196 = vmatpush1.bf16.msra.mxu1 %v3968_v60  ;;  %v4030_v57 = vld [vmem:[#allocation9 + $0x2cc] ss:$16 sps:$4 sm:$0xff]   ;;  %v4025_v60 = vld [vmem:[#allocation9 + $0xc8] ss:$16 sps:$4 sm:$0xff]  }
 0x13d   :  { %2156 = vmatprep.subr.bf16.mxu0 %v3973_v61  ;;  %2197 = vmatprep.subr.bf16.mxu1 %v3976_v62  ;;  %v4028_v61 = vld [vmem:[#allocation9 + $0x2c8] ss:$16 sps:$4 sm:$0xff]   ;;  %v4033_v62 = vld [vmem:[#allocation9 + $0xac] ss:$16 sps:$4 sm:$0xff]  }
 0x140   :  { %2157 = vmatpush2.bf16.msra.mxu0 %v3971_v1  ;;  %2198 = vmatpush2.bf16.msra.mxu1 %v3974_v2  ;;  %v4036_v1 = vld [vmem:[#allocation9 + $0x2ac] ss:$16 sps:$4 sm:$0xff]   ;;  %v4031_v2 = vld [vmem:[#allocation9 + $0xa8] ss:$16 sps:$4 sm:$0xff]  }
 0x141   :  { %2158 = vmatprep.subr.bf16.mxu0 %v3979_v4  ;;  %2199 = vmatprep.subr.bf16.mxu1 %v3982_v5  ;;  %v4034_v4 = vld [vmem:[#allocation9 + $0x2a8] ss:$16 sps:$4 sm:$0xff]   ;;  %v4039_v5 = vld [vmem:[#allocation9 + $0x8c] ss:$16 sps:$4 sm:$0xff]  }
 0x144   :  { %2159 = vmatpush2.bf16.msra.mxu0 %v3977_v7  ;;  %2200 = vmatpush2.bf16.msra.mxu1 %v3980_v8  ;;  %v4042_v7 = vld [vmem:[#allocation9 + $0x28c] ss:$16 sps:$4 sm:$0xff]   ;;  %v4037_v8 = vld [vmem:[#allocation9 + $0x88] ss:$16 sps:$4 sm:$0xff]  }
 0x145   :  { %2160 = vmatprep.subr.bf16.mxu0 %v3985_v9  ;;  %2201 = vmatprep.subr.bf16.mxu1 %v3988_v10  ;;  %v4045_v9 = vld [vmem:[#allocation9 + $0x6c] ss:$16 sps:$4 sm:$0xff]  }
 0x146   :  { %v4048_v10 = vld [vmem:[#allocation9 + $0x26c] ss:$16 sps:$4 sm:$0xff]  }
 0x148   :  { %2161 = vmatpush2.bf16.msra.mxu0 %v3983_v11  ;;  %2202 = vmatpush2.bf16.msra.mxu1 %v3986_v12  ;;  %v4046_v11 = vld [vmem:[#allocation9 + $0x268] ss:$16 sps:$4 sm:$0xff]   ;;  %v4051_v12 = vld [vmem:[#allocation9 + $0x4c] ss:$16 sps:$4 sm:$0xff]  }
 0x149   :  { %2162 = vmatprep.subr.bf16.mxu0 %v3991_v13  ;;  %2203 = vmatprep.subr.bf16.mxu1 %v3994_v14  ;;  %v4054_v13 = vld [vmem:[#allocation9 + $0x24c] ss:$16 sps:$4 sm:$0xff]   ;;  %v4049_v14 = vld [vmem:[#allocation9 + $0x48] ss:$16 sps:$4 sm:$0xff]  }
 0x14c   :  { %2163 = vmatpush2.bf16.msra.mxu0 %v3989_v15  ;;  %2204 = vmatpush2.bf16.msra.mxu1 %v3992_v16  ;;  %v4052_v15 = vld [vmem:[#allocation9 + $0x248] ss:$16 sps:$4 sm:$0xff]   ;;  %v4057_v16 = vld [vmem:[#allocation9 + $0x2c] ss:$16 sps:$4 sm:$0xff]  }
 0x14d   :  { %2164 = vmatprep.subr.bf16.mxu0 %v3997_v17  ;;  %2205 = vmatprep.subr.bf16.mxu1 %v4000_v18  ;;  %v4060_v17 = vld [vmem:[#allocation9 + $0x22c] ss:$16 sps:$4 sm:$0xff]   ;;  %v4055_v18 = vld [vmem:[#allocation9 + $0x28] ss:$16 sps:$4 sm:$0xff]  }
 0x150   :  { %2165 = vmatpush2.bf16.msra.mxu0 %v3995_v19  ;;  %2206 = vmatpush2.bf16.msra.mxu1 %v3998_v22  ;;  %v4058_v19 = vld [vmem:[#allocation9 + $0x228] ss:$16 sps:$4 sm:$0xff]   ;;  %v4066_v22 = vld [vmem:[#allocation9 + $0x20c] ss:$16 sps:$4 sm:$0xff]  }
 0x151   :  { %2166 = vmatprep.subr.bf16.mxu0 %v4003_v24  ;;  %2207 = vmatprep.subr.bf16.mxu1 %v4006_v27  ;;  %v4064_v24 = vld [vmem:[#allocation9 + $0x208] ss:$16 sps:$4 sm:$0xff]   ;;  %v4069_v27 = vld [vmem:[#allocation9 + $0x1ec] ss:$16 sps:$4 sm:$0xff]  }
 0x154   :  { %2167 = vmatpush2.bf16.msra.mxu0 %v4001_v38  ;;  %2208 = vmatpush2.bf16.msra.mxu1 %v4004_v40  ;;  %v4067_v38 = vld [vmem:[#allocation9 + $0x1e8] ss:$16 sps:$4 sm:$0xff]   ;;  %v4075_v40 = vld [vmem:[#allocation9 + $0x1cc] ss:$16 sps:$4 sm:$0xff]  }
 0x155   :  { %2168 = vmatprep.subr.bf16.mxu0 %v4009_v41  ;;  %2209 = vmatprep.subr.bf16.mxu1 %v4012_v42  ;;  %v4078_v41 = vld [vmem:[#allocation9 + $0x3cc] ss:$16 sps:$4 sm:$0xff]   ;;  %v4073_v42 = vld [vmem:[#allocation9 + $0x1c8] ss:$16 sps:$4 sm:$0xff]  }
 0x158   :  { %2169 = vmatpush2.bf16.msra.mxu0 %v4007_v44  ;;  %2210 = vmatpush2.bf16.msra.mxu1 %v4010_v46  ;;  %v4081_v44 = vld [vmem:[#allocation9 + $0x1ac] ss:$16 sps:$4 sm:$0xff]   ;;  %v4079_v46 = vld [vmem:[#allocation9 + $0x1a8] ss:$16 sps:$4 sm:$0xff]  }
 0x159   :  { %2170 = vmatprep.subr.bf16.mxu0 %v4015_v47  ;;  %2211 = vmatprep.subr.bf16.mxu1 %v4018_v48  ;;  %v4082_v47 = vld [vmem:[#allocation9 + $0x3a8] ss:$16 sps:$4 sm:$0xff]   ;;  %v4087_v48 = vld [vmem:[#allocation9 + $0x18c] ss:$16 sps:$4 sm:$0xff]  }
 0x15c   :  { %2171 = vmatpush2.bf16.msra.mxu0 %v4013_v32  ;;  %2212 = vmatpush2.bf16.msra.mxu1 %v4016_v51  ;;  %v4085_v32 = vld [vmem:[#allocation9 + $0x188] ss:$16 sps:$4 sm:$0xff]   ;;  %v4093_v51 = vld [vmem:[#allocation9 + $0x16c] ss:$16 sps:$4 sm:$0xff]  }
 0x15d   :  { %2222 = vmatprep.subr.bf16.mxu0 %v4021_v52  ;;  %2263 = vmatprep.subr.bf16.mxu1 %v4024_v6  ;;  %v4096_v52 = vld [vmem:[#allocation9 + $0x36c] ss:$16 sps:$4 sm:$0xff]   ;;  %v4091_v6 = vld [vmem:[#allocation9 + $0x168] ss:$16 sps:$4 sm:$0xff]  }
 0x15f   :  { %2173 = vmatmul.mubr.bf16.vlgmr.msra.gmra.mxu0 %v4668_v54  ;;  %2214 = vmatmul.mubr.bf16.vlgmr.msra.gmra.mxu1 %v4666_v53 }
 0x160   :  { %2223 = vmatpush1.bf16.msra.mxu0 %v4019_v3  ;;  %2254 = vmatprep.mubr.bf16.mxu0 %v4630_v59  ;;  %v4040_v59 = vld [vmem:[#allocation9 + $0x288] ss:$16 sps:$4 sm:$0xff]  }
 0x161   :  { %2264 = vmatpush1.bf16.msra.mxu1 %v4022_v55  ;;  %2295 = vmatprep.mubr.bf16.mxu1 %v4635_v0  ;;  %v4043_v0 = vld [vmem:[#allocation9 + $0x68] ss:$16 sps:$4 sm:$0xff]   ;;  %v4099_v55 = vld [vmem:[#allocation9 + $0x14c] ss:$16 sps:$4 sm:$0xff]  }
 0x162   :  { %2224 = vmatprep.subr.bf16.mxu0 %v4027_v56  ;;  %2265 = vmatprep.subr.bf16.mxu1 %v4030_v57  ;;  %v4094_v3 = vld [vmem:[#allocation9 + $0x368] ss:$16 sps:$4 sm:$0xff]   ;;  %v4102_v56 = vld [vmem:[#allocation9 + $0x34c] ss:$16 sps:$4 sm:$0xff]  }
 0x163   :  { %v4097_v57 = vld [vmem:[#allocation9 + $0x148] ss:$16 sps:$4 sm:$0xff]  }
 0x164   :  { %2225 = vmatpush1.bf16.msra.mxu0 %v4025_v60  ;;  %v4100_v60 = vld [vmem:[#allocation9 + $0x348] ss:$16 sps:$4 sm:$0xff]  }
 0x165   :  { %2266 = vmatpush1.bf16.msra.mxu1 %v4028_v61  ;;  %2226 = vmatprep.subr.bf16.mxu0 %v4033_v62  ;;  %v4105_v61 = vld [vmem:[#allocation9 + $0x12c] ss:$16 sps:$4 sm:$0xff]  }
 0x166   :  { %2267 = vmatprep.subr.bf16.mxu1 %v4036_v1  ;;  %v4108_v62 = vld [vmem:[#allocation9 + $0x32c] ss:$16 sps:$4 sm:$0xff]   ;;  %v4103_v1 = vld [vmem:[#allocation9 + $0x128] ss:$16 sps:$4 sm:$0xff]  }
 0x168   :  { %2227 = vmatpush1.bf16.msra.mxu0 %v4031_v2  ;;  %v4106_v2 = vld [vmem:[#allocation9 + $0x328] ss:$16 sps:$4 sm:$0xff]  }
 0x169   :  { %2268 = vmatpush1.bf16.msra.mxu1 %v4034_v4  ;;  %2228 = vmatprep.subr.bf16.mxu0 %v4039_v5  ;;  %v4111_v4 = vld [vmem:[#allocation9 + $0x10c] ss:$16 sps:$4 sm:$0xff]  }
 0x16a   :  { %2269 = vmatprep.subr.bf16.mxu1 %v4042_v7  ;;  %v4114_v5 = vld [vmem:[#allocation9 + $0x30c] ss:$16 sps:$4 sm:$0xff]   ;;  %v4109_v7 = vld [vmem:[#allocation9 + $0x108] ss:$16 sps:$4 sm:$0xff]  }
 0x16c   :  { %2229 = vmatpush1.bf16.msra.mxu0 %v4037_v8  ;;  %v4112_v8 = vld [vmem:[#allocation9 + $0x308] ss:$16 sps:$4 sm:$0xff]  }
 0x16d   :  { %2270 = vmatpush1.bf16.msra.mxu1 %v4040_v59  ;;  %2230 = vmatprep.subr.bf16.mxu0 %v4045_v9  ;;  %v4117_v59 = vld [vmem:[#allocation9 + $0x4ec] ss:$16 sps:$4 sm:$0xff]  }
 0x16e   :  { %2271 = vmatprep.subr.bf16.mxu1 %v4048_v10  ;;  %v4120_v9 = vld [vmem:[#allocation9 + $0x6ec] ss:$16 sps:$4 sm:$0xff]   ;;  %v4115_v10 = vld [vmem:[#allocation9 + $0x4e8] ss:$16 sps:$4 sm:$0xff]  }
 0x170   :  { %2231 = vmatpush1.bf16.msra.mxu0 %v4043_v0  ;;  %v4118_v0 = vld [vmem:[#allocation9 + $0x6e8] ss:$16 sps:$4 sm:$0xff]  }
 0x171   :  { %2272 = vmatpush1.bf16.msra.mxu1 %v4046_v11  ;;  %2232 = vmatprep.subr.bf16.mxu0 %v4051_v12  ;;  %v4123_v11 = vld [vmem:[#allocation9 + $0x4cc] ss:$16 sps:$4 sm:$0xff]  }
 0x172   :  { %2273 = vmatprep.subr.bf16.mxu1 %v4054_v13  ;;  %v4126_v12 = vld [vmem:[#allocation9 + $0x6cc] ss:$16 sps:$4 sm:$0xff]   ;;  %v4121_v13 = vld [vmem:[#allocation9 + $0x4c8] ss:$16 sps:$4 sm:$0xff]  }
 0x174   :  { %2233 = vmatpush1.bf16.msra.mxu0 %v4049_v14  ;;  %v4124_v14 = vld [vmem:[#allocation9 + $0x6c8] ss:$16 sps:$4 sm:$0xff]  }
 0x175   :  { %2274 = vmatpush1.bf16.msra.mxu1 %v4052_v15  ;;  %2234 = vmatprep.subr.bf16.mxu0 %v4057_v16  ;;  %v4129_v15 = vld [vmem:[#allocation9 + $0x4ac] ss:$16 sps:$4 sm:$0xff]  }
 0x176   :  { %2275 = vmatprep.subr.bf16.mxu1 %v4060_v17  ;;  %v4132_v16 = vld [vmem:[#allocation9 + $0x6ac] ss:$16 sps:$4 sm:$0xff]   ;;  %v4127_v17 = vld [vmem:[#allocation9 + $0x4a8] ss:$16 sps:$4 sm:$0xff]  }
 0x178   :  { %2235 = vmatpush1.bf16.msra.mxu0 %v4055_v18  ;;  %v4135_v18 = vld [vmem:[#allocation9 + $0x48c] ss:$16 sps:$4 sm:$0xff]  }
 0x179   :  { %2276 = vmatpush1.bf16.msra.mxu1 %v4058_v19  ;;  %2236 = vmatprep.subr.bf16.mxu0 %v4063_v20  ;;  %v4133_v19 = vld [vmem:[#allocation9 + $0x488] ss:$16 sps:$4 sm:$0xff]   ;;  %v4141_v20 = vld [vmem:[#allocation9 + $0x46c] ss:$16 sps:$4 sm:$0xff]  }
 0x17a   :  { %2277 = vmatprep.subr.bf16.mxu1 %v4066_v22  ;;  %v4144_v22 = vld [vmem:[#allocation9 + $0x66c] ss:$16 sps:$4 sm:$0xff]  }
 0x17c   :  { %2237 = vmatpush1.bf16.msra.mxu0 %v4061_v23  ;;  %v4142_v23 = vld [vmem:[#allocation9 + $0x668] ss:$16 sps:$4 sm:$0xff]  }
 0x17d   :  { %2278 = vmatpush1.bf16.msra.mxu1 %v4064_v24  ;;  %2238 = vmatprep.subr.bf16.mxu0 %v4069_v27  ;;  %v4147_v24 = vld [vmem:[#allocation9 + $0x44c] ss:$16 sps:$4 sm:$0xff]  }
 0x17e   :  { %2279 = vmatprep.subr.bf16.mxu1 %v4072_v30  ;;  %v4150_v27 = vld [vmem:[#allocation9 + $0x64c] ss:$16 sps:$4 sm:$0xff]   ;;  %v4145_v30 = vld [vmem:[#allocation9 + $0x448] ss:$16 sps:$4 sm:$0xff]  }
 0x180   :  { %2239 = vmatpush2.bf16.msra.mxu0 %v4067_v38  ;;  %v4148_v38 = vld [vmem:[#allocation9 + $0x648] ss:$16 sps:$4 sm:$0xff]  }
 0x181   :  { %2280 = vmatpush2.bf16.msra.mxu1 %v4070_v39  ;;  %2240 = vmatprep.subr.bf16.mxu0 %v4075_v40  ;;  %v4153_v39 = vld [vmem:[#allocation9 + $0x42c] ss:$16 sps:$4 sm:$0xff]  }
 0x182   :  { %2281 = vmatprep.subr.bf16.mxu1 %v4078_v41  ;;  %v4156_v40 = vld [vmem:[#allocation9 + $0x62c] ss:$16 sps:$4 sm:$0xff]   ;;  %v4151_v41 = vld [vmem:[#allocation9 + $0x428] ss:$16 sps:$4 sm:$0xff]  }
 0x184   :  { %2241 = vmatpush2.bf16.msra.mxu0 %v4073_v42  ;;  %v4154_v42 = vld [vmem:[#allocation9 + $0x628] ss:$16 sps:$4 sm:$0xff]  }
 0x185   :  { %2282 = vmatpush2.bf16.msra.mxu1 %v4076_v43  ;;  %2242 = vmatprep.subr.bf16.mxu0 %v4081_v44  ;;  %v4159_v43 = vld [vmem:[#allocation9 + $0x40c] ss:$16 sps:$4 sm:$0xff]  }
 0x186   :  { %2283 = vmatprep.subr.bf16.mxu1 %v4084_v45  ;;  %v4162_v44 = vld [vmem:[#allocation9 + $0x60c] ss:$16 sps:$4 sm:$0xff]   ;;  %v4157_v45 = vld [vmem:[#allocation9 + $0x408] ss:$16 sps:$4 sm:$0xff]  }
 0x188   :  { %2243 = vmatpush2.bf16.msra.mxu0 %v4079_v46  ;;  %v4160_v46 = vld [vmem:[#allocation9 + $0x608] ss:$16 sps:$4 sm:$0xff]  }
 0x189   :  { %2284 = vmatpush2.bf16.msra.mxu1 %v4082_v47  ;;  %2244 = vmatprep.subr.bf16.mxu0 %v4087_v48  ;;  %v4165_v47 = vld [vmem:[#allocation9 + $0x5ec] ss:$16 sps:$4 sm:$0xff]  }
 0x18a   :  { %2285 = vmatprep.subr.bf16.mxu1 %v4090_v49  ;;  %v4168_v48 = vld [vmem:[#allocation9 + $0x7ec] ss:$16 sps:$4 sm:$0xff]   ;;  %v4163_v49 = vld [vmem:[#allocation9 + $0x5e8] ss:$16 sps:$4 sm:$0xff]  }
 0x18c   :  { %2245 = vmatpush2.bf16.msra.mxu0 %v4085_v32  ;;  %v4166_v32 = vld [vmem:[#allocation9 + $0x7e8] ss:$16 sps:$4 sm:$0xff]  }
 0x18d   :  { %2286 = vmatpush2.bf16.msra.mxu1 %v4088_v50  ;;  %2246 = vmatprep.subr.bf16.mxu0 %v4093_v51  ;;  %v4171_v50 = vld [vmem:[#allocation9 + $0x5cc] ss:$16 sps:$4 sm:$0xff]  }
 0x18e   :  { %2287 = vmatprep.subr.bf16.mxu1 %v4096_v52  ;;  %v4174_v51 = vld [vmem:[#allocation9 + $0x7cc] ss:$16 sps:$4 sm:$0xff]   ;;  %v4169_v52 = vld [vmem:[#allocation9 + $0x5c8] ss:$16 sps:$4 sm:$0xff]  }
 0x190   :  { %2247 = vmatpush2.bf16.msra.mxu0 %v4091_v6  ;;  %v4172_v6 = vld [vmem:[#allocation9 + $0x7c8] ss:$16 sps:$4 sm:$0xff]  }
 0x191   :  { %2288 = vmatpush2.bf16.msra.mxu1 %v4094_v3  ;;  %2248 = vmatprep.subr.bf16.mxu0 %v4099_v55  ;;  %v4177_v3 = vld [vmem:[#allocation9 + $0x5ac] ss:$16 sps:$4 sm:$0xff]  }
 0x192   :  { %2289 = vmatprep.subr.bf16.mxu1 %v4102_v56  ;;  %v4180_v55 = vld [vmem:[#allocation9 + $0x7ac] ss:$16 sps:$4 sm:$0xff]   ;;  %v4175_v56 = vld [vmem:[#allocation9 + $0x5a8] ss:$16 sps:$4 sm:$0xff]  }
 0x194   :  { %2249 = vmatpush2.bf16.msra.mxu0 %v4097_v57  ;;  %v4178_v57 = vld [vmem:[#allocation9 + $0x7a8] ss:$16 sps:$4 sm:$0xff]  }
 0x195   :  { %2290 = vmatpush2.bf16.msra.mxu1 %v4100_v60  ;;  %2250 = vmatprep.subr.bf16.mxu0 %v4105_v61  ;;  %v4183_v60 = vld [vmem:[#allocation9 + $0x58c] ss:$16 sps:$4 sm:$0xff]  }
 0x196   :  { %2291 = vmatprep.subr.bf16.mxu1 %v4108_v62  ;;  %v4186_v61 = vld [vmem:[#allocation9 + $0x78c] ss:$16 sps:$4 sm:$0xff]   ;;  %v4181_v62 = vld [vmem:[#allocation9 + $0x588] ss:$16 sps:$4 sm:$0xff]  }
 0x198   :  { %2251 = vmatpush2.bf16.msra.mxu0 %v4103_v1  ;;  %v4184_v1 = vld [vmem:[#allocation9 + $0x788] ss:$16 sps:$4 sm:$0xff]  }
 0x199   :  { %2292 = vmatpush2.bf16.msra.mxu1 %v4106_v2  ;;  %2252 = vmatprep.subr.bf16.mxu0 %v4111_v4  ;;  %v4189_v2 = vld [vmem:[#allocation9 + $0x56c] ss:$16 sps:$4 sm:$0xff]  }
 0x19a   :  { %2293 = vmatprep.subr.bf16.mxu1 %v4114_v5  ;;  %v4192_v4 = vld [vmem:[#allocation9 + $0x76c] ss:$16 sps:$4 sm:$0xff]   ;;  %v4187_v5 = vld [vmem:[#allocation9 + $0x568] ss:$16 sps:$4 sm:$0xff]  }
 0x19c   :  { %2253 = vmatpush2.bf16.msra.mxu0 %v4109_v7  ;;  %v4190_v7 = vld [vmem:[#allocation9 + $0x768] ss:$16 sps:$4 sm:$0xff]  }
 0x19d   :  { %2294 = vmatpush2.bf16.msra.mxu1 %v4112_v8  ;;  %2304 = vmatprep.subr.bf16.mxu0 %v4117_v59  ;;  %v4195_v8 = vld [vmem:[#allocation9 + $0x54c] ss:$16 sps:$4 sm:$0xff]  }
 0x19e   :  { %2345 = vmatprep.subr.bf16.mxu1 %v4120_v9  ;;  %v4198_v59 = vld [vmem:[#allocation9 + $0x74c] ss:$16 sps:$4 sm:$0xff]   ;;  %v4193_v9 = vld [vmem:[#allocation9 + $0x548] ss:$16 sps:$4 sm:$0xff]  }
 0x19f   :  { %2255 = vmatmul.mubr.bf16.vlgmr.msra.gmra.mxu0 %v4633_v63  ;;  %v4130_v63 = vld [vmem:[#allocation9 + $0x6a8] ss:$16 sps:$4 sm:$0xff]  }
 0x1a0   :  { %2296 = vmatmul.mubr.bf16.vlgmr.msra.gmra.mxu1 %v4628_v58  ;;  %2305 = vmatpush1.bf16.msra.mxu0 %v4115_v10  ;;  %v4138_v58 = vld [vmem:[#allocation9 + $0x68c] ss:$16 sps:$4 sm:$0xff]   ;;  %v4196_v10 = vld [vmem:[#allocation9 + $0x748] ss:$16 sps:$4 sm:$0xff]  }
 0x1a1   :  { %2336 = vmatprep.mubr.bf16.mxu0 %v4646_v21  ;;  %2346 = vmatpush1.bf16.msra.mxu1 %v4118_v0  ;;  %v4136_v21 = vld [vmem:[#allocation9 + $0x688] ss:$16 sps:$4 sm:$0xff]   ;;  %v4201_v0 = vld [vmem:[#allocation9 + $0x52c] ss:$16 sps:$4 sm:$0xff]  }
 0x1a2   :  { %2377 = vmatprep.mubr.bf16.mxu1 %v4648_v25  ;;  %2306 = vmatprep.subr.bf16.mxu0 %v4123_v11  ;;  %v4139_v25 = vld [vmem:[#allocation9 + $0x468] ss:$16 sps:$4 sm:$0xff]   ;;  %v4204_v11 = vld [vmem:[#allocation9 + $0x72c] ss:$16 sps:$4 sm:$0xff]  }
 0x1a3   :  { %2347 = vmatprep.subr.bf16.mxu1 %v4126_v12  ;;  %v4199_v12 = vld [vmem:[#allocation9 + $0x528] ss:$16 sps:$4 sm:$0xff]  }
 0x1a4   :  { %2307 = vmatpush1.bf16.msra.mxu0 %v4121_v13  ;;  %v4202_v13 = vld [vmem:[#allocation9 + $0x728] ss:$16 sps:$4 sm:$0xff]  }
 0x1a5   :  { %2348 = vmatpush1.bf16.msra.mxu1 %v4124_v14  ;;  %2308 = vmatprep.subr.bf16.mxu0 %v4129_v15  ;;  %v4207_v14 = vld [vmem:[#allocation9 + $0x50c] ss:$16 sps:$4 sm:$0xff]  }
 0x1a6   :  { %2349 = vmatprep.subr.bf16.mxu1 %v4132_v16  ;;  %v4210_v15 = vld [vmem:[#allocation9 + $0x70c] ss:$16 sps:$4 sm:$0xff]   ;;  %v4205_v16 = vld [vmem:[#allocation9 + $0x508] ss:$16 sps:$4 sm:$0xff]  }
 0x1a8   :  { %2309 = vmatpush1.bf16.msra.mxu0 %v4127_v17  ;;  %v4208_v17 = vld [vmem:[#allocation9 + $0x708] ss:$16 sps:$4 sm:$0xff]  }
 0x1a9   :  { %2350 = vmatpush1.bf16.msra.mxu1 %v4130_v63  ;;  %2310 = vmatprep.subr.bf16.mxu0 %v4135_v18  ;;  %v4213_v63 = vld [vmem:[#allocation12 + $0xac] ss:$12 sps:$4 sm:$0xff]   ;;  %v4211_v18 = vld [vmem:[#allocation12 + $0xa8] ss:$12 sps:$4 sm:$0xff]  }
 0x1aa   :  { %2351 = vmatprep.subr.bf16.mxu1 %v4138_v58  ;;  %v4216_v58 = vld [vmem:[#allocation12 + $0x94] ss:$12 sps:$4 sm:$0xff]  }
 0x1ac   :  { %2311 = vmatpush1.bf16.msra.mxu0 %v4133_v19 }
 0x1ad   :  { %2352 = vmatpush1.bf16.msra.mxu1 %v4136_v21  ;;  %2312 = vmatprep.subr.bf16.mxu0 %v4141_v20  ;;  %v4214_v20 = vld [vmem:[#allocation12 + $0x90] ss:$12 sps:$4 sm:$0xff]  }
 0x1ae   :  { %2353 = vmatprep.subr.bf16.mxu1 %v4144_v22 }
 0x1b0   :  { %2313 = vmatpush1.bf16.msra.mxu0 %v4139_v25  ;;  %v4219_v25 = vld [vmem:[#allocation12 + $0x7c] ss:$12 sps:$4 sm:$0xff]  }
 0x1b1   :  { %2354 = vmatpush1.bf16.msra.mxu1 %v4142_v23  ;;  %2314 = vmatprep.subr.bf16.mxu0 %v4147_v24 }
 0x1b2   :  { %2355 = vmatprep.subr.bf16.mxu1 %v4150_v27 }
 0x1b4   :  { %2315 = vmatpush1.bf16.msra.mxu0 %v4145_v30  ;;  %v4217_v30 = vld [vmem:[#allocation12 + $0x78] ss:$12 sps:$4 sm:$0xff]  }
 0x1b5   :  { %2356 = vmatpush1.bf16.msra.mxu1 %v4148_v38  ;;  %2316 = vmatprep.subr.bf16.mxu0 %v4153_v39 }
 0x1b6   :  { %2357 = vmatprep.subr.bf16.mxu1 %v4156_v40  ;;  %v4275_v40 = vld [vmem:[#allocation12 + $0x228] ss:$12 sps:$4 sm:$0xff]  }
 0x1b8   :  { %2317 = vmatpush1.bf16.msra.mxu0 %v4151_v41  ;;  %v4280_v41 = vld [vmem:[#allocation12 + $0x214] ss:$12 sps:$4 sm:$0xff]  }
 0x1b9   :  { %2358 = vmatpush1.bf16.msra.mxu1 %v4154_v42  ;;  %2318 = vmatprep.subr.bf16.mxu0 %v4159_v43  ;;  %v4220_v42 = vld [vmem:[#allocation12 + $0x60] ss:$12 sps:$4 sm:$0xff]  }
 0x1ba   :  { %2359 = vmatprep.subr.bf16.mxu1 %v4162_v44  ;;  %v4225_v43 = vld [vmem:[#allocation12 + $0x4c] ss:$12 sps:$4 sm:$0xff]   ;;  %v4278_v44 = vld [vmem:[#allocation12 + $0x210] ss:$12 sps:$4 sm:$0xff]  }
 0x1bc   :  { %2319 = vmatpush1.bf16.msra.mxu0 %v4157_v45  ;;  %v4283_v45 = vld [vmem:[#allocation12 + $0x1fc] ss:$12 sps:$4 sm:$0xff]  }
 0x1bd   :  { %2360 = vmatpush1.bf16.msra.mxu1 %v4160_v46  ;;  %2320 = vmatprep.subr.bf16.mxu0 %v4165_v47  ;;  %v4223_v46 = vld [vmem:[#allocation12 + $0x48] ss:$12 sps:$4 sm:$0xff]  }
 0x1be   :  { %2361 = vmatprep.subr.bf16.mxu1 %v4168_v48  ;;  %v4228_v47 = vld [vmem:[#allocation12 + $0x34] ss:$12 sps:$4 sm:$0xff]   ;;  %v4281_v48 = vld [vmem:[#allocation12 + $0x1f8] ss:$12 sps:$4 sm:$0xff]  }
 0x1c0   :  { %2321 = vmatpush2.bf16.msra.mxu0 %v4163_v49  ;;  %v4286_v49 = vld [vmem:[#allocation12 + $0x1e4] ss:$12 sps:$4 sm:$0xff]  }
 0x1c1   :  { %2362 = vmatpush2.bf16.msra.mxu1 %v4166_v32  ;;  %2322 = vmatprep.subr.bf16.mxu0 %v4171_v50  ;;  %v4226_v32 = vld [vmem:[#allocation12 + $0x30] ss:$12 sps:$4 sm:$0xff]  }
 0x1c2   :  { %2363 = vmatprep.subr.bf16.mxu1 %v4174_v51  ;;  %v4231_v50 = vld [vmem:[#allocation12 + $0x1c] ss:$12 sps:$4 sm:$0xff]   ;;  %v4284_v51 = vld [vmem:[#allocation12 + $0x1e0] ss:$12 sps:$4 sm:$0xff]  }
 0x1c4   :  { %2323 = vmatpush2.bf16.msra.mxu0 %v4169_v52  ;;  %v4289_v52 = vld [vmem:[#allocation12 + $0x1cc] ss:$12 sps:$4 sm:$0xff]  }
 0x1c5   :  { %2364 = vmatpush2.bf16.msra.mxu1 %v4172_v6  ;;  %2324 = vmatprep.subr.bf16.mxu0 %v4177_v3  ;;  %v4229_v6 = vld [vmem:[#allocation12 + $0x18] ss:$12 sps:$4 sm:$0xff]  }
 0x1c6   :  { %2365 = vmatprep.subr.bf16.mxu1 %v4180_v55  ;;  %v4234_v3 = vld [vmem:[#allocation12 + $0x4] ss:$12 sps:$4 sm:$0xff]   ;;  %v4287_v55 = vld [vmem:[#allocation12 + $0x1c8] ss:$12 sps:$4 sm:$0xff]  }
 0x1c8   :  { %2325 = vmatpush2.bf16.msra.mxu0 %v4175_v56  ;;  %v4292_v56 = vld [vmem:[#allocation12 + $0x1b4] ss:$12 sps:$4 sm:$0xff]  }
 0x1c9   :  { %2366 = vmatpush2.bf16.msra.mxu1 %v4178_v57  ;;  %2326 = vmatprep.subr.bf16.mxu0 %v4183_v60  ;;  %v4232_v57 = vld [vmem:[#allocation12] ss:$12 sps:$4 sm:$0xff]  }
 0x1ca   :  { %2367 = vmatprep.subr.bf16.mxu1 %v4186_v61  ;;  %v4237_v60 = vld [vmem:[#allocation12 + $0x16c] ss:$12 sps:$4 sm:$0xff]   ;;  %v4290_v61 = vld [vmem:[#allocation12 + $0x1b0] ss:$12 sps:$4 sm:$0xff]  }
 0x1cc   :  { %2327 = vmatpush2.bf16.msra.mxu0 %v4181_v62  ;;  %v4295_v62 = vld [vmem:[#allocation12 + $0x19c] ss:$12 sps:$4 sm:$0xff]  }
 0x1cd   :  { %2368 = vmatpush2.bf16.msra.mxu1 %v4184_v1  ;;  %2328 = vmatprep.subr.bf16.mxu0 %v4189_v2  ;;  %v4235_v1 = vld [vmem:[#allocation12 + $0x168] ss:$12 sps:$4 sm:$0xff]  }
 0x1ce   :  { %2369 = vmatprep.subr.bf16.mxu1 %v4192_v4  ;;  %v4240_v2 = vld [vmem:[#allocation12 + $0x154] ss:$12 sps:$4 sm:$0xff]   ;;  %v4293_v4 = vld [vmem:[#allocation12 + $0x198] ss:$12 sps:$4 sm:$0xff]  }
 0x1d0   :  { %2329 = vmatpush2.bf16.msra.mxu0 %v4187_v5  ;;  %v4298_v5 = vld [vmem:[#allocation12 + $0x184] ss:$12 sps:$4 sm:$0xff]  }
 0x1d1   :  { %2370 = vmatpush2.bf16.msra.mxu1 %v4190_v7  ;;  %2330 = vmatprep.subr.bf16.mxu0 %v4195_v8  ;;  %v4238_v7 = vld [vmem:[#allocation12 + $0x150] ss:$12 sps:$4 sm:$0xff]  }
 0x1d2   :  { %2371 = vmatprep.subr.bf16.mxu1 %v4198_v59  ;;  %v4243_v8 = vld [vmem:[#allocation12 + $0x13c] ss:$12 sps:$4 sm:$0xff]   ;;  %v4296_v59 = vld [vmem:[#allocation12 + $0x180] ss:$12 sps:$4 sm:$0xff]  }
 0x1d4   :  { %2331 = vmatpush2.bf16.msra.mxu0 %v4193_v9  ;;  %v4301_v9 = vld [vmem:[#allocation12 + $0x2ec] ss:$12 sps:$4 sm:$0xff]  }
 0x1d5   :  { %2372 = vmatpush2.bf16.msra.mxu1 %v4196_v10  ;;  %2332 = vmatprep.subr.bf16.mxu0 %v4201_v0  ;;  %v4241_v10 = vld [vmem:[#allocation12 + $0x138] ss:$12 sps:$4 sm:$0xff]  }
 0x1d6   :  { %2373 = vmatprep.subr.bf16.mxu1 %v4204_v11  ;;  %v4246_v0 = vld [vmem:[#allocation12 + $0x124] ss:$12 sps:$4 sm:$0xff]   ;;  %v4299_v11 = vld [vmem:[#allocation12 + $0x2e8] ss:$12 sps:$4 sm:$0xff]  }
 0x1d8   :  { %2333 = vmatpush2.bf16.msra.mxu0 %v4199_v12  ;;  %v4304_v12 = vld [vmem:[#allocation12 + $0x2d4] ss:$12 sps:$4 sm:$0xff]  }
 0x1d9   :  { %2374 = vmatpush2.bf16.msra.mxu1 %v4202_v13  ;;  %2334 = vmatprep.subr.bf16.mxu0 %v4207_v14  ;;  %v4244_v13 = vld [vmem:[#allocation12 + $0x120] ss:$12 sps:$4 sm:$0xff]  }
 0x1da   :  { %2375 = vmatprep.subr.bf16.mxu1 %v4210_v15  ;;  %v4249_v14 = vld [vmem:[#allocation12 + $0x10c] ss:$12 sps:$4 sm:$0xff]   ;;  %v4302_v15 = vld [vmem:[#allocation12 + $0x2d0] ss:$12 sps:$4 sm:$0xff]  }
 0x1dc   :  { %2335 = vmatpush2.bf16.msra.mxu0 %v4205_v16  ;;  %v4307_v16 = vld [vmem:[#allocation12 + $0x2bc] ss:$12 sps:$4 sm:$0xff]  }
 0x1dd   :  { %2376 = vmatpush2.bf16.msra.mxu1 %v4208_v17  ;;  %3077 = vmatprep.subr.bf16.mxu0 %v4213_v63  ;;  %v4247_v17 = vld [vmem:[#allocation12 + $0x108] ss:$12 sps:$4 sm:$0xff]  }
 0x1de   :  { %v4252_v63 = vld [vmem:[#allocation12 + $0xf4] ss:$12 sps:$4 sm:$0xff]  }
 0x1df   :  { %2337 = vmatmul.mubr.bf16.vlgmr.msra.gmra.mxu0 %v4668_v54  ;;  %v4679_v19 = vpop.f32.mrf.mxu0  ;;  %v4682_v21 = vpop.f32.mrf.mxu1  ;;  %v4222_v54 = vld [vmem:[#allocation12 + $0x64] ss:$12 sps:$4 sm:$0xff]  }
 0x1e0   :  { %2378 = vmatmul.mubr.bf16.vlgmr.msra.gmra.mxu1 %v4666_v53  ;;  %3078 = vmatpush1.bf16.msra.mxu0 %v4211_v18  ;;  %v4277_v53 = vld [vmem:[#allocation12 + $0x22c] ss:$12 sps:$4 sm:$0xff]  }
 0x1e1   :  { %v4684_v22 = vpop.f32.mrf.mxu0  ;;  %3079 = vmatprep.subr.bf16.mxu0 %v4216_v58  ;;  %v4686_v23 = vpop.f32.mrf.mxu1  ;;  %3118 = vmatprep.subr.bf16.mxu1 %v4277_v53  ;;  %v4305_v18 = vld [vmem:[#allocation12 + $0x2b8] ss:$12 sps:$4 sm:$0xff]   ;;  %v2093_v53 = vadd.f32 %v4679_v19, %v4650_v26  ;;  %v4316_v19 = vld [vmem:[#allocation12 + $0x274] ss:$12 sps:$4 sm:$0xff]  }
 0x1e2   :  { %3119 = vmatpush1.bf16.msra.mxu1 %v4275_v40  ;;  %v4310_v58 = vld [vmem:[#allocation12 + $0x2a4] ss:$12 sps:$4 sm:$0xff]  }
 0x1e3   :  { %v2096_v24 = vpop.f32.mrf.mxu0  ;;  %v2137_v27 = vpop.f32.mrf.mxu1  ;;  %3120 = vmatprep.subr.bf16.mxu1 %v4280_v41  ;;  %v4259_v40 = vld [vmem:[#allocation12 + $0x170] ss:$12 sps:$4 sm:$0xff]   ;;  %v2095_v41 = vadd.f32 %v4684_v22, %v4656_v29 }
 0x1e4   :  { %3080 = vmatpush1.bf16.msra.mxu0 %v4214_v20  ;;  %v4250_v20 = vld [vmem:[#allocation12 + $0xf0] ss:$12 sps:$4 sm:$0xff]   ;;  %v4308_v24 = vld [vmem:[#allocation12 + $0x2a0] ss:$12 sps:$4 sm:$0xff]  }
 0x1e5   :  { %v2097_v38 = vpop.f32.mrf.mxu0  ;;  %3081 = vmatprep.subr.bf16.mxu0 %v4219_v25  ;;  %v2138_v39 = vpop.f32.mrf.mxu1  ;;  %v4255_v25 = vld [vmem:[#allocation12 + $0xdc] ss:$12 sps:$4 sm:$0xff]   ;;  %v4313_v27 = vld [vmem:[#allocation12 + $0x28c] ss:$12 sps:$4 sm:$0xff]  }
 0x1e6   :  { %3121 = vmatpush1.bf16.msra.mxu1 %v4278_v44  ;;  %v4258_v38 = vld [vmem:[#allocation12 + $0xc4] ss:$12 sps:$4 sm:$0xff]   ;;  %v4256_v39 = vld [vmem:[#allocation12 + $0xc0] ss:$12 sps:$4 sm:$0xff]  }
 0x1e7   :  { %3122 = vmatprep.subr.bf16.mxu1 %v4283_v45  ;;  %v2136_v45 = vadd.f32 %v4686_v23, %v2095_v41  ;;  %v4314_v29 = vld [vmem:[#allocation12 + $0x270] ss:$12 sps:$4 sm:$0xff]  }
 0x1e8   :  { %3082 = vmatpush1.bf16.msra.mxu0 %v4217_v30  ;;  %v4253_v30 = vld [vmem:[#allocation12 + $0xd8] ss:$12 sps:$4 sm:$0xff]  }
 0x1e9   :  { %3083 = vmatprep.subr.bf16.mxu0 %v4222_v54  ;;  %v4311_v54 = vld [vmem:[#allocation12 + $0x288] ss:$12 sps:$4 sm:$0xff]  }
 0x1ea   :  { %3123 = vmatpush1.bf16.msra.mxu1 %v4281_v48 }
 0x1eb   :  { %3124 = vmatprep.subr.bf16.mxu1 %v4286_v49 }
 0x1ec   :  { %3084 = vmatpush1.bf16.msra.mxu0 %v4220_v42  ;;  %v4695_v42 = vld [vmem:[%s4731_s5] sm:$0xf] }
 0x1ed   :  { %3085 = vmatprep.subr.bf16.mxu0 %v4225_v43  ;;  %v2134_v43 = vadd.f32 %v4682_v21, %v2093_v53  ;;  %v2391_v26 = vrot.slane %v4695_v42, %v4608_v33 }
 0x1ee   :  { %3125 = vmatpush1.bf16.msra.mxu1 %v4284_v51 }
 0x1ef   :  { %3126 = vmatprep.subr.bf16.mxu1 %v4289_v52 }
 0x1f0   :  { %3086 = vmatpush1.bf16.msra.mxu0 %v4223_v46 }
 0x1f1   :  { %3087 = vmatprep.subr.bf16.mxu0 %v4228_v47 }
 0x1f2   :  { %3127 = vmatpush1.bf16.msra.mxu1 %v4287_v55  ;;  %v4317_v55 = vld [vmem:[#allocation12 + $0x258] ss:$12 sps:$4 sm:$0xff]  }
 0x1f3   :  { %3128 = vmatprep.subr.bf16.mxu1 %v4292_v56 }
 0x1f4   :  { %3088 = vmatpush1.bf16.msra.mxu0 %v4226_v32 }
 0x1f5   :  { %3089 = vmatprep.subr.bf16.mxu0 %v4231_v50  ;;  %v2395_v50 = vrot.slane %v4695_v42, %v4614_v35 }
 0x1f6   :  { %3129 = vmatpush1.bf16.msra.mxu1 %v4290_v61 }
 0x1f7   :  { %3130 = vmatprep.subr.bf16.mxu1 %v4295_v62  ;;  %v4322_v62 = vld [vmem:[#allocation12 + $0x244] ss:$12 sps:$4 sm:$0xff]  }
 0x1f8   :  { %3090 = vmatpush1.bf16.msra.mxu0 %v4229_v6  ;;  %v4319_v6 = vld [vmem:[#allocation12 + $0x25c] ss:$12 sps:$4 sm:$0xff]  }
 0x1f9   :  { %3091 = vmatprep.subr.bf16.mxu0 %v4234_v3 }
 0x1fa   :  { %3131 = vmatpush1.bf16.msra.mxu1 %v4293_v4  ;;  %v4260_v4 = vld [vmem:[#allocation12 + $0xb0] ss:$12 sps:$4 sm:$0xff]  }
 0x1fb   :  { %3132 = vmatprep.subr.bf16.mxu1 %v4298_v5 }
 0x1fc   :  { %3092 = vmatpush1.bf16.msra.mxu0 %v4232_v57 }
 0x1fd   :  { %3093 = vmatprep.subr.bf16.mxu0 %v4237_v60 }
 0x1fe   :  { %3133 = vmatpush1.bf16.msra.mxu1 %v4296_v59  ;;  %v4262_v59 = vld [vmem:[#allocation12 + $0x98] ss:$12 sps:$4 sm:$0xff]  }
 0x1ff   :  { %3134 = vmatprep.subr.bf16.mxu1 %v4301_v9  ;;  %v4263_v9 = vld [vmem:[#allocation12 + $0x140] ss:$12 sps:$4 sm:$0xff]  }
 0x200   :  { %3094 = vmatpush2.bf16.msra.mxu0 %v4235_v1  ;;  %v4320_v1 = vld [vmem:[#allocation12 + $0x240] ss:$12 sps:$4 sm:$0xff]  }
 0x201   :  { %3095 = vmatprep.subr.bf16.mxu0 %v4240_v2 }
 0x202   :  { %3135 = vmatpush2.bf16.msra.mxu1 %v4299_v11  ;;  %v4266_v11 = vld [vmem:[#allocation12 + $0x68] ss:$12 sps:$4 sm:$0xff]  }
 0x203   :  { %3136 = vmatprep.subr.bf16.mxu1 %v4304_v12  ;;  %v4267_v12 = vld [vmem:[#allocation12 + $0x110] ss:$12 sps:$4 sm:$0xff]  }
 0x204   :  { %3096 = vmatpush2.bf16.msra.mxu0 %v4238_v7  ;;  %v4261_v7 = vld [vmem:[#allocation12 + $0x158] ss:$12 sps:$4 sm:$0xff]  }
 0x205   :  { %3097 = vmatprep.subr.bf16.mxu0 %v4243_v8  ;;  %v4323_v8 = vld [vmem:[#allocation12 + $0x2f0] ss:$12 sps:$4 sm:$0xff]  }
 0x206   :  { %3137 = vmatpush2.bf16.msra.mxu1 %v4302_v15  ;;  %v4270_v15 = vld [vmem:[#allocation12 + $0x38] ss:$12 sps:$4 sm:$0xff]  }
 0x207   :  { %3138 = vmatprep.subr.bf16.mxu1 %v4307_v16  ;;  %v4271_v16 = vld [vmem:[#allocation12 + $0xe0] ss:$12 sps:$4 sm:$0xff]  }
 0x208   :  { %3098 = vmatpush2.bf16.msra.mxu0 %v4241_v10  ;;  %v4264_v10 = vld [vmem:[#allocation12 + $0x80] ss:$12 sps:$4 sm:$0xff]  }
 0x209   :  { %3099 = vmatprep.subr.bf16.mxu0 %v4246_v0  ;;  %v4265_v0 = vld [vmem:[#allocation12 + $0x128] ss:$12 sps:$4 sm:$0xff]  }
 0x20a   :  { %3139 = vmatpush2.bf16.msra.mxu1 %v4305_v18  ;;  %v4274_v18 = vld [vmem:[#allocation12 + $0x8] ss:$12 sps:$4 sm:$0xff]  }
 0x20b   :  { %3140 = vmatprep.subr.bf16.mxu1 %v4310_v58 }
 0x20c   :  { %3100 = vmatpush2.bf16.msra.mxu0 %v4244_v13  ;;  %v4268_v13 = vld [vmem:[#allocation12 + $0x50] ss:$12 sps:$4 sm:$0xff]  }
 0x20d   :  { %3101 = vmatprep.subr.bf16.mxu0 %v4249_v14  ;;  %v4269_v14 = vld [vmem:[#allocation12 + $0xf8] ss:$12 sps:$4 sm:$0xff]  }
 0x20e   :  { %3141 = vmatpush2.bf16.msra.mxu1 %v4308_v24 }
 0x20f   :  { %3142 = vmatprep.subr.bf16.mxu1 %v4313_v27 }
 0x210   :  { %3102 = vmatpush2.bf16.msra.mxu0 %v4247_v17  ;;  %v4272_v17 = vld [vmem:[#allocation12 + $0x20] ss:$12 sps:$4 sm:$0xff]  }
 0x211   :  { %3103 = vmatprep.subr.bf16.mxu0 %v4252_v63  ;;  %v4273_v63 = vld [vmem:[#allocation12 + $0xc8] ss:$12 sps:$4 sm:$0xff]  }
 0x212   :  { %3143 = vmatpush2.bf16.msra.mxu1 %v4311_v54 }
 0x213   :  { %3144 = vmatprep.subr.bf16.mxu1 %v4316_v19 }
 0x214   :  { %3104 = vmatpush2.bf16.msra.mxu0 %v4250_v20 }
 0x215   :  { %3105 = vmatprep.subr.bf16.mxu0 %v4255_v25 }
 0x216   :  { %3145 = vmatpush2.bf16.msra.mxu1 %v4314_v29  ;;  %v2403_v29 = vrot.slane %v4695_v42, %v141_v36  ;;  %v4327_v36 = vld [vmem:[#allocation12 + $0x2c0] ss:$12 sps:$4 sm:$0xff]  }
 0x217   :  { %3146 = vmatprep.subr.bf16.mxu1 %v4319_v6  ;;  %v4324_v6 = vld [vmem:[#allocation12 + $0x230] ss:$12 sps:$4 sm:$0xff]  }
 0x218   :  { %3106 = vmatpush2.bf16.msra.mxu0 %v4253_v30 }
 0x219   :  { %3107 = vmatprep.subr.bf16.mxu0 %v4258_v38 }
 0x21a   :  { %3147 = vmatpush2.bf16.msra.mxu1 %v4317_v55  ;;  %v4325_v55 = vld [vmem:[#allocation12 + $0x2d8] ss:$12 sps:$4 sm:$0xff]  }
 0x21b   :  { %3148 = vmatprep.subr.bf16.mxu1 %v4322_v62  ;;  %v4332_v62 = vld [vmem:[#allocation12 + $0x1d0] ss:$12 sps:$4 sm:$0xff]  }
 0x21c   :  { %3108 = vmatpush2.bf16.msra.mxu0 %v4256_v39 }
 0x21d   :  { %3752 = vmatprep.subr.bf16.mxu0 %v4259_v40 }
 0x21e   :  { %3149 = vmatpush2.bf16.msra.mxu1 %v4320_v1  ;;  %v4333_v1 = vld [vmem:[#allocation12 + $0x278] ss:$12 sps:$4 sm:$0xff]  }
 0x21f   :  { %v2174_v44 = vpop.f32.mrf.mxu0  ;;  %v2215_v47 = vpop.f32.mrf.mxu1  ;;  %3774 = vmatprep.subr.bf16.mxu1 %v4323_v8  ;;  %v4338_v8 = vld [vmem:[#allocation12 + $0x188] ss:$12 sps:$4 sm:$0xff]  }
 0x220   :  { %v2175_v46 = vadd.f32 %v2174_v44, %v2134_v43 }
 0x221   :  { %v2176_v48 = vpop.f32.mrf.mxu0  ;;  %v2217_v32 = vpop.f32.mrf.mxu1 }
 0x222   :  { %v2216_v22 = vadd.f32 %v2215_v47, %v2175_v46  ;;  %v2177_v49 = vadd.f32 %v2176_v48, %v2136_v45  ;;  %v2399_v46 = vrot.slane %v4695_v42, %v4611_v34  ;;  %v4328_v42 = vld [vmem:[#allocation12 + $0x200] ss:$12 sps:$4 sm:$0xff]  }
 0x223   :  { %v2178_v51 = vpop.f32.mrf.mxu0  ;;  %v2219_v23 = vpop.f32.mrf.mxu1 }
 0x224   :  { %v2408_v21 = vadd.f32 %v2391_v26, %v2216_v22  ;;  %v2218_v52 = vadd.f32 %v2217_v32, %v2177_v49 }
 0x225   :  { %v2179_v3 = vpop.f32.mrf.mxu0  ;;  %v2220_v57 = vpop.f32.mrf.mxu1 }
 0x226   :  { %v2409_v56 = vadd.f32 %v2395_v50, %v2218_v52  ;;  %v2412_v60 = vmax.f32 %v2408_v21, 0.0  ;;  %v4329_v57 = vld [vmem:[#allocation12 + $0x2a8] ss:$12 sps:$4 sm:$0xff]  }
 0x228   :  { %v2413_v61 = vmax.f32 %v2409_v56, 0.0  ;;  %v2416_v5 = vpack.c.bf16 %v2412_v60, %v2412_v60  ;;  %v4326_v56 = vld [vmem:[#allocation12 + $0x218] ss:$12 sps:$4 sm:$0xff]   ;;  %v4330_v60 = vld [vmem:[#allocation12 + $0x1e8] ss:$12 sps:$4 sm:$0xff]  }
 0x22a   :  { %v2417_v2 = vpack.c.bf16 %v2413_v61, %v2413_v61  ;;  %v4331_v61 = vld [vmem:[#allocation12 + $0x290] ss:$12 sps:$4 sm:$0xff]  }
 0x22c   :  { %3109 = vmatprep.mubr.bf16.mxu0 %v2417_v2 }
 0x22d   :  { %3110 = vmatmul.mubr.bf16.vlgmr.msra.gmra.mxu0 %v2416_v5 }
 0x22e   :  { %3753 = vmatpush3.bf16.msra.mxu0 %v4260_v4  ;;  %3191 = vmatprep.mubr.bf16.mxu0 %v2417_v2  ;;  %v4334_v2 = vld [vmem:[#allocation12 + $0x1b8] ss:$12 sps:$4 sm:$0xff]   ;;  %v4335_v4 = vld [vmem:[#allocation12 + $0x260] ss:$12 sps:$4 sm:$0xff]  }
 0x22f   :  { %3754 = vmatprep.subr.bf16.mxu0 %v4261_v7  ;;  %v4337_v7 = vld [vmem:[#allocation12 + $0x248] ss:$12 sps:$4 sm:$0xff]  }
 0x232   :  { %3755 = vmatpush3.bf16.msra.mxu0 %v4262_v59 }
 0x233   :  { %3756 = vmatprep.subr.bf16.mxu0 %v4263_v9 }
 0x236   :  { %3757 = vmatpush3.bf16.msra.mxu0 %v4264_v10 }
 0x237   :  { %3758 = vmatprep.subr.bf16.mxu0 %v4265_v0 }
 0x23a   :  { %3759 = vmatpush3.bf16.msra.mxu0 %v4266_v11 }
 0x23b   :  { %3760 = vmatprep.subr.bf16.mxu0 %v4267_v12 }
 0x23e   :  { %3761 = vmatpush3.bf16.msra.mxu0 %v4268_v13 }
 0x23f   :  { %3762 = vmatprep.subr.bf16.mxu0 %v4269_v14 }
 0x242   :  { %3763 = vmatpush3.bf16.msra.mxu0 %v4270_v15  ;;  %v4502_v15 = vmov 1966171168  }
 0x243   :  { %3764 = vmatprep.subr.bf16.mxu0 %v4271_v16  ;;  %v3258_v16 = vunpack.c.l.s4 %v4502_v15 }
 0x246   :  { %3765 = vmatpush3.bf16.msra.mxu0 %v4272_v17 }
 0x247   :  { %3766 = vmatprep.subr.bf16.mxu0 %v4273_v63  ;;  %v3259_v63 = vunpack.c.0.s8 %v3258_v16 }
 0x24a   :  { %3767 = vmatpush3.bf16.msra.mxu0 %v4274_v18  ;;  %v3751_v18 = vld.sshfl [vmem:[%s4734_s8] sm:$0x13 pattern:$0x75316420] }
 0x24d   :  { %3192 = vmatmul.mubr.bf16.vlgmr.msra.gmra.mxu0 %v2416_v5  ;;  %v4336_v5 = vld [vmem:[#allocation12 + $0x1a0] ss:$12 sps:$4 sm:$0xff]  }
 0x25f   :  { %v2256_v58 = vpop.f32.mrf.mxu0 }
 0x260   :  { %v2297_v20 = vpop.f32.mrf.mxu1  ;;  %v2257_v39 = vadd.f32 %v2256_v58, %v4653_v28  ;;  %v3256_v58 = vcombine.high %v3751_v18, %v3751_v18 }
 0x261   :  { %v2258_v25 = vpop.f32.mrf.mxu0 }
 0x262   :  { %v2299_v24 = vpop.f32.mrf.mxu1  ;;  %v2259_v40 = vadd.f32 %v2258_v25, %v4658_v37  ;;  %v2298_v53 = vadd.f32 %v2297_v20, %v2257_v39  ;;  %v3262_v20 = vsub.s32 %v3259_v63, %v4603_v31  ;;  %v4503_v25 = vmov 0.0  }
 0x263   :  { %v2260_v27 = vpop.f32.mrf.mxu0 }
 0x264   :  { %v2301_v30 = vpop.f32.mrf.mxu1  ;;  %v2300_v43 = vadd.f32 %v2299_v24, %v2259_v40  ;;  %v3270_v24 = vrot.slane %v3256_v58, %v3262_v20  ;;  %v3263_v27 = vrot.slane %v3751_v18, %v3262_v20 }
 0x265   :  { %v2261_v38 = vpop.f32.mrf.mxu0  ;;  %v2548_v30 = vld [vmem:[%s4733_s7] sm:$0x7] }
 0x266   :  { %v2302_v54 = vpop.f32.mrf.mxu1  ;;  %3307 = vmatprep.mubr.bf16.mxu0 %v3270_v24  ;;  %v2553_v38 = vrot.slane %v2548_v30, %v4608_v33 }
 0x267   :  { %v2557_v54 = vrot.slane %v2548_v30, %v4614_v35 }
 0x29f   :  { %v2338_v41 = vpop.f32.mrf.mxu0 }
 0x2a0   :  { %v2339_v44 = vadd.f32 %v2338_v41, %v2298_v53  ;;  %v2379_v45 = vpop.f32.mrf.mxu1 }
 0x2a1   :  { %v2340_v47 = vpop.f32.mrf.mxu0 }
 0x2a2   :  { %v2380_v26 = vadd.f32 %v2379_v45, %v2339_v44  ;;  %v2341_v19 = vadd.f32 %v2340_v47, %v2300_v43  ;;  %v2381_v48 = vpop.f32.mrf.mxu1 }
 0x2a3   :  { %v2342_v22 = vpop.f32.mrf.mxu0 }
 0x2a4   :  { %v2410_v28 = vadd.f32 %v2399_v46, %v2380_v26  ;;  %v2382_v49 = vadd.f32 %v2381_v48, %v2341_v19  ;;  %v2383_v37 = vpop.f32.mrf.mxu1  ;;  %v2561_v48 = vrot.slane %v2548_v30, %v4611_v34  ;;  %v3247_v34 = vstv %s4735_s9 }
 0x2a5   :  { %v2343_v32 = vpop.f32.mrf.mxu0 }
 0x2a6   :  { %v2411_v50 = vadd.f32 %v2403_v29, %v2382_v49  ;;  %v2384_v51 = vpop.f32.mrf.mxu1  ;;  %v2414_v21 = vmax.f32 %v2410_v28, 0.0 }
 0x2a7   :  { %v3271_v51 = vcombine.high %v3263_v27, %v3263_v27 }
 0x2a8   :  { %v2415_v52 = vmax.f32 %v2411_v50, 0.0  ;;  %v2418_v3 = vpack.c.bf16 %v2414_v21, %v2414_v21 }
 0x2aa   :  { %v2419_v23 = vpack.c.bf16 %v2415_v52, %v2415_v52 }
 0x2ac   :  { %3150 = vmatprep.mubr.bf16.mxu1 %v2419_v23 }
 0x2ad   :  { %3151 = vmatmul.mubr.bf16.vlgmr.msra.gmra.mxu1 %v2418_v3 }
 0x2ae   :  { %3775 = vmatpush3.bf16.msra.mxu1 %v4324_v6  ;;  %3231 = vmatprep.mubr.bf16.mxu1 %v2419_v23 }
 0x2af   :  { %3776 = vmatprep.subr.bf16.mxu1 %v4325_v55 }
 0x2b2   :  { %3777 = vmatpush3.bf16.msra.mxu1 %v4326_v56 }
 0x2b3   :  { %3778 = vmatprep.subr.bf16.mxu1 %v4327_v36 }
 0x2b6   :  { %3779 = vmatpush3.bf16.msra.mxu1 %v4328_v42 }
 0x2b7   :  { %3780 = vmatprep.subr.bf16.mxu1 %v4329_v57 }
 0x2ba   :  { %3781 = vmatpush3.bf16.msra.mxu1 %v4330_v60 }
 0x2bb   :  { %3782 = vmatprep.subr.bf16.mxu1 %v4331_v61 }
 0x2be   :  { %3783 = vmatpush3.bf16.msra.mxu1 %v4332_v62 }
 0x2bf   :  { %3784 = vmatprep.subr.bf16.mxu1 %v4333_v1 }
 0x2c2   :  { %3785 = vmatpush3.bf16.msra.mxu1 %v4334_v2 }
 0x2c3   :  { %3786 = vmatprep.subr.bf16.mxu1 %v4335_v4 }
 0x2c6   :  { %3787 = vmatpush3.bf16.msra.mxu1 %v4336_v5 }
 0x2c7   :  { %3788 = vmatprep.subr.bf16.mxu1 %v4337_v7 }
 0x2ca   :  { %3789 = vmatpush3.bf16.msra.mxu1 %v4338_v8 }
 0x2cb   :  { %3798 = vmatprep.subr.bf16.mxu1 %v4503_v25 }
 0x2cd   :  { %3232 = vmatmul.mubr.bf16.vlgmr.msra.gmra.mxu1 %v2418_v3 }
 0x2ce   :  { %3800 = vmatprep.mubr.msk.bf16.mxu1 %vm4504_vm2, %v4503_v25 }
 0x2ed   :  { %v3111_v59 = vpop.f32.mrf.mxu0 }
 0x2ee   :  { %v3112_v39 = vadd.f32 %v3111_v59, %v2553_v38 }
 0x2ef   :  { %v3113_v9 = vpop.f32.mrf.mxu0 }
 0x2f0   :  { %v3114_v53 = vadd.f32 %v3113_v9, %v2557_v54 }
 0x2f1   :  { %v3115_v10 = vpop.f32.mrf.mxu0 }
 0x2f3   :  { %v3116_v0 = vpop.f32.mrf.mxu0 }
 0x30d   :  { %v3768_v11 = vpop.f32.mrf.mxu0 }
 0x30f   :  { %v3769_v12 = vpop.f32.mrf.mxu0 }
 0x310   :  { %v3770_v13 = vadd.f32 %v3769_v12, %v3768_v11 }
 0x311   :  { %v3771_v14 = vpop.f32.mrf.mxu0 }
 0x312   :  { %v3194_v35 = vadd.f32 %v3770_v13, %v2561_v48 }
 0x313   :  { %v3772_v17 = vpop.f32.mrf.mxu0 }
 0x36d   :  { %v3152_v40 = vpop.f32.mrf.mxu1 }
 0x36e   :  { %v3153_v41 = vadd.f32 %v3152_v40, %v3112_v39 }
 0x36f   :  { %v3154_v31 = vpop.f32.mrf.mxu1 }
 0x370   :  { %v3155_v43 = vadd.f32 %v3154_v31, %v3114_v53  ;;  %v3239_v44 = vmax.f32 %v3153_v41, 0.0 }
 0x371   :  { %v3156_v45 = vpop.f32.mrf.mxu1 }
 0x372   :  { %v3240_v46 = vmax.f32 %v3155_v43, 0.0  ;;  %v3243_v19 = vpack.c.bf16 %v3239_v44, %v3239_v44 }
 0x373   :  { %v3157_v47 = vpop.f32.mrf.mxu1 }
 0x374   :  { %v3244_v26 = vpack.c.bf16 %v3240_v46, %v3240_v46 }
 0x376   :  { %3289 = vmatprep.subr.bf16.mxu0 %v3244_v26 }
 0x377   :  { %3290 = vmatpush1.bf16.xpose.msra.mxu0 %v3243_v19 }
 0x37e   :  { %3308 = vmatmul.mubr.bf16.vlgmr.msra.gmra.mxu0 %v3263_v27 }
 0x38d   :  { %v3790_v33 = vpop.f32.mrf.mxu1 }
 0x38f   :  { %v3791_v29 = vpop.f32.mrf.mxu1 }
 0x390   :  { %v3792_v22 = vadd.f32 %v3791_v29, %v3790_v33 }
 0x391   :  { %v3793_v28 = vpop.f32.mrf.mxu1 }
 0x392   :  { %v3234_v49 = vadd.f32 %v3792_v22, %v3194_v35 }
 0x393   :  { %v3794_v37 = vpop.f32.mrf.mxu1 }
 0x394   :  { %v3241_v32 = vmax.f32 %v3234_v49, 0.0 }
 0x396   :  { %v3245_v50 = vpack.c.bf16 %v3241_v32, %v3241_v32 }
 0x398   :  { %3799 = vmatpush3.bf16.xpose.msra.mxu1 %v3245_v50 }
 0x39f   :  { %3801 = vmatmul.mubr.bf16.vlgmr.msra.gmra.mxu1 %v3271_v51 }
 0x43e   :  { %v3309_v21 = vpop.f32.mrf.mxu0 }
 0x43f   :  { %v3310_v3 = vadd.f32 %v3309_v21, %v3247_v34 }
 0x440   :  { %v3311_v52 = vpop.f32.mrf.mxu0 }
 0x442   :  { %v3312_v23 = vpop.f32.mrf.mxu0 }
 0x444   :  { %v3313_v6 = vpop.f32.mrf.mxu0 }
 0x45f   :  { %v3349_v55 = vpop.f32.mrf.mxu1 }
 0x460   :  { %v3350_v56 = vadd.f32 %v3349_v55, %v3310_v3 }
 0x461   :  { %v3802_v36 = vpop.f32.mrf.mxu1 }
 0x462   :  { %3356 = vst.msk [vmem:[#allocation14] sm:$0x1] %vm3355_vm3, %v3350_v56 }
 0x463   :  { %v3352_v42 = vpop.f32.mrf.mxu1 }
 0x464   :  { %4470 = shalt.err (!%p4467_p6)
}
 0x465   :  { %3366 = dma.vmem_to_hbm [thread:$0]  %s3364_s29, 16, %s4736_s10, [#allocation5]   ;;  %v3803_v57 = vpop.f32.mrf.mxu1 }
 0x466   :  { %4487 = dma.done.wait [#allocation5], 16  }
 0x467   :  { %4488 = vsyncadd [#allocation5], 4294967280 }
 0x468   :  { %3370 = vsyncpa [#allocation4], 1 }
 0x469   :  { %3371 = vsyncpa [#allocation7], 1 }
 0x46a   :  { %3372 = vsyncpa [#allocation10], 1 }
 0x46b   :  { %3373 = vsyncpa [#allocation13], 1 }
 0x46c   :  { %3374 = vsyncpa [#allocation5], 1 }

</bundles_post_ra>
